<compile_context>
chip_gen: v7x
topology: tpu7x:2x2x1
jax: 0.10.0
libtpu: 0.0.40
codegen_flags: <defaults>
</compile_context>

<pallas_src>
import jax
import jax.numpy as jnp
import numpy as np
from jax.experimental import pallas as pl
from jax.experimental.pallas import tpu as pltpu

# Keep the pure-JAX reference numerically comparable to the in-kernel
# f32 MXU matmuls.
jax.config.update("jax_default_matmul_precision", "highest")


# ---------------------------------------------------------------------------
# Pallas kernel: whole forward pass for one tile of tile_n batch rows.
# Layout: batch on the lane axis.
#   inp_ref  : (2, tile_n)   -- [x; t] transposed
#   wt_ref   : (3, H, H)     -- pre-fused, pre-transposed layer weights W_i.T
#   misc_ref : (H, 128)      -- packed small operands:
#                               col 0: start_w[:, 0]
#                               col 1: start_w[:, 1]
#                               col 2: start_b
#                               col 3: end_w (as a column)
#                               col 4 (row 0): end_b
#   out_ref  : (1, tile_n)   -- lane-dense output block
# ---------------------------------------------------------------------------
def _lr_pinn_kernel(inp_ref, wt_ref, misc_ref, out_ref):
    sw0 = misc_ref[:, 0:1]        # (H, 1)
    sw1 = misc_ref[:, 1:2]        # (H, 1)
    sb = misc_ref[:, 2:3]         # (H, 1)
    ew = misc_ref[:, 3:4]         # (H, 1)
    eb = misc_ref[0:1, 4:5]       # (1, 1)

    x_row = inp_ref[0:1, :]       # (1, tile_n)
    t_row = inp_ref[1:2, :]       # (1, tile_n)

    # Start layer: K=2 contraction done as VPU broadcast FMAs (no MXU).
    h = jnp.tanh(sw0 * x_row + sw1 * t_row + sb)          # (H, tile_n)

    # Three low-rank hidden layers: h = tanh(W_i.T @ h) on the MXU.
    h = jnp.tanh(jnp.dot(wt_ref[0], h, preferred_element_type=jnp.float32))
    h = jnp.tanh(jnp.dot(wt_ref[1], h, preferred_element_type=jnp.float32))
    h = jnp.tanh(jnp.dot(wt_ref[2], h, preferred_element_type=jnp.float32))

    # End layer: M=1 matmul done as VPU multiply + sublane reduction.
    out = jnp.sum(ew * h, axis=0, keepdims=True) + eb      # (1, tile_n)
    out_ref[...] = out


# ---------------------------------------------------------------------------
# Wrapper: fuses grid-invariant weights once, packs small operands into one
# lane-dense slab, pads the batch, and calls pallas_call with a lane-dense
# batch-on-lanes layout.
# ---------------------------------------------------------------------------
def lr_pinn_forward(x, t, params, *, tile_n=None):
    H = params["start_w"].shape[0]

    # ----- grid-invariant weight fusion (done once, outside the kernel) -----
    def fused_wt(col, alpha, row):
        # W = col @ diag(alpha) @ row.T ; we need W.T for the (H, tile_n) layout.
        return ((col * alpha[None, :]) @ row.T).T                       # (H, H)

    wt = jnp.stack(
        [fused_wt(params["col_0"], params["alpha_0"], params["row_0"]),
         fused_wt(params["col_1"], params["alpha_1"], params["row_1"]),
         fused_wt(params["col_2"], params["alpha_2"], params["row_2"])],
        axis=0).astype(jnp.float32)                                     # (3, H, H)

    # ----- pack the four small operands into one (H, 128) lane-dense slab ---
    misc = jnp.zeros((H, 128), jnp.float32)
    misc = misc.at[:, 0].set(params["start_w"][:, 0].astype(jnp.float32))
    misc = misc.at[:, 1].set(params["start_w"][:, 1].astype(jnp.float32))
    misc = misc.at[:, 2].set(params["start_b"].reshape(H).astype(jnp.float32))
    misc = misc.at[:, 3].set(params["end_w"].reshape(H).astype(jnp.float32))
    misc = misc.at[0, 4].set(params["end_b"].reshape(()).astype(jnp.float32))

    # ----- data layout: batch on lanes -----
    inp = jnp.concatenate([x, t], axis=1).astype(jnp.float32).T         # (2, N)
    N = inp.shape[1]

    if tile_n is None:
        # 2 grid steps by default: minimum to feed both v7x TensorCores;
        # only one extra step of overhead on single-TC v5e/v6e.
        tile_n = -(-(-(-N // 2)) // 128) * 128                          # ceil(N/2) -> 128 mult
    tile_n = max(128, (tile_n // 128) * 128)

    n_pad = (-N) % tile_n
    if n_pad:
        inp = jnp.pad(inp, ((0, 0), (0, n_pad)))
    Np = N + n_pad
    num_tiles = Np // tile_n

    in_specs = [
        pl.BlockSpec((2, tile_n), lambda i: (0, i)),
        pl.BlockSpec((3, H, H), lambda i: (0, 0, 0)),
        pl.BlockSpec((H, 128), lambda i: (0, 0)),
    ]
    out_spec = pl.BlockSpec((1, tile_n), lambda i: (0, i))

    flops = 2 * Np * (2 * H + 3 * H * H + H)
    cost = pl.CostEstimate(
        flops=flops,
        transcendentals=4 * Np * H,
        bytes_accessed=4 * (2 * Np + 3 * H * H + H * 128 + Np))

    out = pl.pallas_call(
        _lr_pinn_kernel,
        out_shape=jax.ShapeDtypeStruct((1, Np), jnp.float32),
        grid=(num_tiles,),
        in_specs=in_specs,
        out_specs=out_spec,
        compiler_params=pltpu.CompilerParams(
            dimension_semantics=("parallel",)),
        cost_estimate=cost,
    )(inp, wt, misc)

    return out.reshape(Np, 1)[:N]


# ---------------------------------------------------------------------------
# Deterministic parameter construction (mirrors the torch constructor args).
# ---------------------------------------------------------------------------
def init_params(key, hidden_dim, rank):
    ks = jax.random.split(key, 13)
    return dict(
        start_w=0.5 * jax.random.normal(ks[0], (hidden_dim, 2), jnp.float32),
        start_b=0.1 * jax.random.normal(ks[1], (hidden_dim,), jnp.float32),
        end_w=0.5 * jax.random.normal(ks[2], (1, hidden_dim), jnp.float32),
        end_b=0.1 * jax.random.normal(ks[3], (1,), jnp.float32),
        col_0=0.3 * jax.random.normal(ks[4], (hidden_dim, rank), jnp.float32),
        col_1=0.3 * jax.random.normal(ks[5], (hidden_dim, rank), jnp.float32),
        col_2=0.3 * jax.random.normal(ks[6], (hidden_dim, rank), jnp.float32),
        row_0=0.3 * jax.random.normal(ks[7], (hidden_dim, rank), jnp.float32),
        row_1=0.3 * jax.random.normal(ks[8], (hidden_dim, rank), jnp.float32),
        row_2=0.3 * jax.random.normal(ks[9], (hidden_dim, rank), jnp.float32),
        alpha_0=0.3 * jax.random.normal(ks[10], (rank,), jnp.float32),
        alpha_1=0.3 * jax.random.normal(ks[11], (rank,), jnp.float32),
        alpha_2=0.3 * jax.random.normal(ks[12], (rank,), jnp.float32),
    )


# Pure-JAX reference matching the PyTorch forward exactly.
def reference_forward(x, t, p):
    def w(col, alpha, row):
        return (col * alpha[None, :]) @ row.T
    inp = jnp.concatenate([x, t], axis=1)
    h = jnp.tanh(inp @ p["start_w"].T + p["start_b"])
    h = jnp.tanh(h @ w(p["col_0"], p["alpha_0"], p["row_0"]))
    h = jnp.tanh(h @ w(p["col_1"], p["alpha_1"], p["row_1"]))
    h = jnp.tanh(h @ w(p["col_2"], p["alpha_2"], p["row_2"]))
    return h @ p["end_w"].T + p["end_b"]


if __name__ == "__main__":
    hidden_dim, rank, N = 32, 8, 1024

    key = jax.random.PRNGKey(0)
    kp, kx, kt = jax.random.split(key, 3)
    params = init_params(kp, hidden_dim, rank)
    x = jax.random.uniform(kx, (N, 1), jnp.float32)
    t = jax.random.uniform(kt, (N, 1), jnp.float32)

    out = lr_pinn_forward(x, t, params)          # 2 grid steps -> both v7x TCs
    out = jax.block_until_ready(out)

    ref = reference_forward(x, t, params)
    np.testing.assert_allclose(np.asarray(out), np.asarray(ref),
                               rtol=1e-5, atol=1e-5)
    print("KERNEL_OK")
</pallas_src>

<mosaic_0001>
module attributes {stable_mosaic.version = 11 : i64} {
  func.func @_lr_pinn_kernel(%arg0: i32, %arg1: memref<2x512xf32, #tpu.memory_space<vmem>>, %arg2: memref<3x32x32xf32, #tpu.memory_space<vmem>>, %arg3: memref<32x128xf32, #tpu.memory_space<vmem>>, %arg4: memref<1x512xf32, #tpu.memory_space<vmem>>) attributes {dimension_semantics = [#tpu.dimension_semantics<parallel>], iteration_bounds = array<i64: 2>, scalar_prefetch = 0 : i64, scratch_operands = 0 : i64, tpu.core_type = #tpu.core_type<tc>, window_params = [{transform_indices = @transform_0, window_bounds = array<i64: 2, 512>}, {pipeline_mode = #tpu.pipeline_mode<synchronous>, transform_indices = @transform_1, window_bounds = array<i64: 3, 32, 32>}, {pipeline_mode = #tpu.pipeline_mode<synchronous>, transform_indices = @transform_2, window_bounds = array<i64: 32, 128>}, {transform_indices = @transform_3, window_bounds = array<i64: 1, 512>}]} {
    %c0 = arith.constant 0 : index
    %c0_0 = arith.constant 0 : index
    %0 = vector.load %arg3[%c0, %c0_0] : memref<32x128xf32, #tpu.memory_space<vmem>>, vector<32x1xf32>
    %c0_1 = arith.constant 0 : index
    %c1 = arith.constant 1 : index
    %1 = vector.load %arg3[%c0_1, %c1] : memref<32x128xf32, #tpu.memory_space<vmem>>, vector<32x1xf32>
    %c0_2 = arith.constant 0 : index
    %c2 = arith.constant 2 : index
    %2 = vector.load %arg3[%c0_2, %c2] : memref<32x128xf32, #tpu.memory_space<vmem>>, vector<32x1xf32>
    %c0_3 = arith.constant 0 : index
    %c3 = arith.constant 3 : index
    %3 = vector.load %arg3[%c0_3, %c3] : memref<32x128xf32, #tpu.memory_space<vmem>>, vector<32x1xf32>
    %c0_4 = arith.constant 0 : index
    %c4 = arith.constant 4 : index
    %4 = vector.load %arg3[%c0_4, %c4] : memref<32x128xf32, #tpu.memory_space<vmem>>, vector<1x1xf32>
    %c0_5 = arith.constant 0 : index
    %c0_6 = arith.constant 0 : index
    %5 = vector.load %arg1[%c0_5, %c0_6] : memref<2x512xf32, #tpu.memory_space<vmem>>, vector<1x512xf32>
    %c1_7 = arith.constant 1 : index
    %c0_8 = arith.constant 0 : index
    %6 = vector.load %arg1[%c1_7, %c0_8] : memref<2x512xf32, #tpu.memory_space<vmem>>, vector<1x512xf32>
    %7 = vector.broadcast %0 : vector<32x1xf32> to vector<32x512xf32>
    %8 = vector.broadcast %5 : vector<1x512xf32> to vector<32x512xf32>
    %9 = arith.mulf %7, %8 : vector<32x512xf32>
    %10 = vector.broadcast %1 : vector<32x1xf32> to vector<32x512xf32>
    %11 = vector.broadcast %6 : vector<1x512xf32> to vector<32x512xf32>
    %12 = arith.mulf %10, %11 : vector<32x512xf32>
    %13 = arith.addf %9, %12 : vector<32x512xf32>
    %14 = vector.broadcast %2 : vector<32x1xf32> to vector<32x512xf32>
    %15 = arith.addf %13, %14 : vector<32x512xf32>
    %16 = math.tanh %15 : vector<32x512xf32>
    %c0_9 = arith.constant 0 : index
    %c0_10 = arith.constant 0 : index
    %c0_11 = arith.constant 0 : index
    %17 = vector.load %arg2[%c0_9, %c0_10, %c0_11] : memref<3x32x32xf32, #tpu.memory_space<vmem>>, vector<1x32x32xf32>
    %18 = vector.shape_cast %17 : vector<1x32x32xf32> to vector<32x32xf32>
    %cst = arith.constant dense<0.000000e+00> : vector<32x512xf32>
    %19 = tpu.matmul %18, %16, %cst {dimension_numbers = #tpu.dot_dimension_numbers<[1], [0], [0], [1], [0, 0, 1, 1], [], []>, precision = #tpu.contract_precision<fp32>} : vector<32x32xf32>, vector<32x512xf32>, vector<32x512xf32> -> vector<32x512xf32>
    %20 = math.tanh %19 : vector<32x512xf32>
    %c1_12 = arith.constant 1 : index
    %c0_13 = arith.constant 0 : index
    %c0_14 = arith.constant 0 : index
    %21 = vector.load %arg2[%c1_12, %c0_13, %c0_14] : memref<3x32x32xf32, #tpu.memory_space<vmem>>, vector<1x32x32xf32>
    %22 = vector.shape_cast %21 : vector<1x32x32xf32> to vector<32x32xf32>
    %cst_15 = arith.constant dense<0.000000e+00> : vector<32x512xf32>
    %23 = tpu.matmul %22, %20, %cst_15 {dimension_numbers = #tpu.dot_dimension_numbers<[1], [0], [0], [1], [0, 0, 1, 1], [], []>, precision = #tpu.contract_precision<fp32>} : vector<32x32xf32>, vector<32x512xf32>, vector<32x512xf32> -> vector<32x512xf32>
    %24 = math.tanh %23 : vector<32x512xf32>
    %c2_16 = arith.constant 2 : index
    %c0_17 = arith.constant 0 : index
    %c0_18 = arith.constant 0 : index
    %25 = vector.load %arg2[%c2_16, %c0_17, %c0_18] : memref<3x32x32xf32, #tpu.memory_space<vmem>>, vector<1x32x32xf32>
    %26 = vector.shape_cast %25 : vector<1x32x32xf32> to vector<32x32xf32>
    %cst_19 = arith.constant dense<0.000000e+00> : vector<32x512xf32>
    %27 = tpu.matmul %26, %24, %cst_19 {dimension_numbers = #tpu.dot_dimension_numbers<[1], [0], [0], [1], [0, 0, 1, 1], [], []>, precision = #tpu.contract_precision<fp32>} : vector<32x32xf32>, vector<32x512xf32>, vector<32x512xf32> -> vector<32x512xf32>
    %28 = math.tanh %27 : vector<32x512xf32>
    %29 = vector.broadcast %3 : vector<32x1xf32> to vector<32x512xf32>
    %30 = arith.mulf %29, %28 : vector<32x512xf32>
    %cst_20 = arith.constant dense<0.000000e+00> : vector<512xf32>
    %31 = vector.multi_reduction <add>, %30, %cst_20 [0] : vector<32x512xf32> to vector<512xf32>
    %32 = vector.shape_cast %31 : vector<512xf32> to vector<1x512xf32>
    %33 = vector.broadcast %4 : vector<1x1xf32> to vector<1x512xf32>
    %34 = arith.addf %32, %33 : vector<1x512xf32>
    %c0_21 = arith.constant 0 : index
    %c0_22 = arith.constant 0 : index
    %35 = vector.load %arg4[%c0_21, %c0_22] : memref<1x512xf32, #tpu.memory_space<vmem>>, vector<1x512xf32>
    tpu.vector_store %arg4[%c0_21, %c0_22], %34 {strides = array<i32>} : memref<1x512xf32, #tpu.memory_space<vmem>>, vector<1x512xf32>,
    return
  }
  func.func @transform_0(%arg0: i32) -> (i32, i32) {
    %c0_i32 = arith.constant 0 : i32
    %c0_i32_0 = arith.constant 0 : i32
    return %c0_i32, %arg0 : i32, i32
  }
  func.func @transform_1(%arg0: i32) -> (i32, i32, i32) {
    %c0_i32 = arith.constant 0 : i32
    %c0_i32_0 = arith.constant 0 : i32
    %c0_i32_1 = arith.constant 0 : i32
    %c0_i32_2 = arith.constant 0 : i32
    return %c0_i32, %c0_i32_0, %c0_i32_1 : i32, i32, i32
  }
  func.func @transform_2(%arg0: i32) -> (i32, i32) {
    %c0_i32 = arith.constant 0 : i32
    %c0_i32_0 = arith.constant 0 : i32
    %c0_i32_1 = arith.constant 0 : i32
    return %c0_i32, %c0_i32_0 : i32, i32
  }
  func.func @transform_3(%arg0: i32) -> (i32, i32) {
    %c0_i32 = arith.constant 0 : i32
    %c0_i32_0 = arith.constant 0 : i32
    return %c0_i32, %arg0 : i32, i32
  }
}

</mosaic_0001>

<bundles_post_ra>
// kernel: tpu_custom_call.1
= control target key start
LH: loop header
LB: loop body
LE: loop exit
PB: predicated region body
PF: predicated region fallthrough
CT: control target
= control target key end

     0   :  { %8 = vsyncpa [#allocation3], 0  ;;  %s7062_s0 = inlined_call_operand.hbm [shape: f32[2,1024], index: 0, kind: input, shape index: {}]   ;;  %s7063_s1 = inlined_call_operand.hbm [shape: f32[3,32,32], index: 1, kind: input, shape index: {}]   ;;  %s7064_s2 = inlined_call_operand.hbm [shape: f32[32,128], index: 2, kind: input, shape index: {}]   ;;  %s7065_s3 = inlined_call_operand.hbm [shape: f32[1,1024], index: 3, kind: output, shape index: {}]  }
   0x1   :  { %10 = vsyncpa [#allocation3 + $0x1], 0 }
   0x2   :  { %11 = vsyncpa [#allocation6], 0 }
   0x3   :  { %12 = vsyncpa [#allocation4], 0 }
   0x4   :  { %14 = vsyncpa [#allocation4 + $0x1], 0  ;;  %s5813_s12 = smov 0   ;;  %s5815_s13 = smov 0  }
   0x5   :  { %s5817_s14 = smov 0   ;;  %s5819_s15 = smov 0  }
   0x6 LB: > { %s5834_s16 = sadd.s32 4294967295, %s5778_s15   ;;  %s4854_s17 = sadd.s32 4294967294, %s5778_s15   ;;  %s5778_s15 = sphi %s5819_s15, %s7143_s15   ;;  %s5774_s14 = sphi %s5817_s14, %s7142_s14   ;;  %s5770_s13 = sphi %s5815_s13, %s7141_s13   ;;  %s5766_s12 = sphi %s5813_s12, %s7140_s12  }
   0x7   : > { %p40_p0 = scmp.ne.s32.totalorder %s5770_s13, %s5766_s12  ;;  %p7066_p1 = scmp.eq.s32.totalorder %s5834_s16, 0 }
   0x8   : > { %p112_p3 = scmp.eq.s32.totalorder %s4854_s17, 1  ;;  %p4855_p5 = scmp.ge.s32.totalorder %s5778_s15, 1 }
   0x9   : > { %p5843_p4 = por %p7066_p1, %p40_p0  ;;  %p119_p7 = scmp.lt.s32.totalorder %s5778_s15, 3 }
   0xa   : > { %p5848_p6 = por %p112_p3, %p40_p0  ;;  %s5780_s21 = smov [#allocation5]  }
   0xb   : > { %s7097_s18 = scalar_select %p5843_p4, 1, 0 }
   0xc   : > { %s7098_s19 = scalar_select %p5848_p6, 1, 0 }
   0xd   : > { %p5853_p8 = pnand %p4855_p5, %p119_p7  ;;  %s131_s22 = sshll.u32 %s5780_s21, 4  ;;  %s5857_s22 = int_to_ptr.vmem [resolvable:$true] %s131_s22 }
   0xe   : > { %s5781_s24 = smov [#allocation7]   ;;  %s5622_s28 = scalar_lea.hbm %s7063_s1, 1536 }
   0xf   : > { %p5415_p9 = pneg %p5853_p8  ;;  %s144_s25 = sshll.u32 %s5781_s24, 4  ;;  %s5868_s25 = int_to_ptr.vmem [resolvable:$true] %s144_s25 }
  0x10   : > { %p5623_p12 = scmp.ne.s32.totalorder %s7063_s1, %s5622_s28  ;;  %p5629_p5 = scmp.lt.u32.totalorder %s5622_s28, %s7063_s1 }
  0x11   : > { %p5864_p11 = pnand %p5415_p9, %p7066_p1 }
  0x13   : > { %p5624_p13 = pneg %p5864_p11 }
  0x15   : > { %p5625_p0 = pnand %p5624_p13, %p5623_p12 }
  0x17   : > { %p5626_p3 = pneg %p5625_p0 }
  0x19   : > { %p5631_p7 = pnand %p5629_p5, %p5626_p3 }
  0x1b   : > { %5634 = shalt.err (!%p5631_p7)
}
  0x1c   : > { %s5635_s6 = scalar_lea.vmem %s5857_s22, 1536  ;;  %p5643_p2 = scmp.lt.s32.totalorder %s5857_s22, %s5857_s22 }
  0x1d   : > { %p5636_p9 = scmp.ne.s32.totalorder %s5857_s22, %s5635_s6  ;;  %p5644_p12 = scmp.lt.s32.totalorder %s5635_s6, %s5635_s6 }
  0x1f   : > { %p5638_p10 = pnand %p5636_p9, %p5624_p13  ;;  %p5645_p0 = por %p5644_p12, %p5643_p2 }
  0x21   : > { %p5639_p1 = pneg %p5638_p10 }
  0x23   : > { %p5646_p6 = pnand %p5645_p0, %p5639_p1 }
  0x25   : > { %5649 = shalt.err (!%p5646_p6)
}
  0x26   : > { %s5782_s7 = smov 128   ;;  %s5783_s8 = smov 8  }
  0x27   : > { %5418 = dma.hbm_to_vmem [thread:$0]  (!%p5864_p11), %s7063_s1, 1536, %s5857_s22, [#allocation6], %s5782_s7, %s5782_s7, %s5783_s8  }
  0x28   : > { %s5650_s21 = scalar_lea.hbm %s7064_s2, 512 }
  0x29   : > { %p5651_p2 = scmp.ne.s32.totalorder %s7064_s2, %s5650_s21  ;;  %p5657_p10 = scmp.lt.u32.totalorder %s5650_s21, %s7064_s2 }
  0x2b   : > { %p5653_p1 = pnand %p5651_p2, %p5624_p13 }
  0x2d   : > { %p5654_p6 = pneg %p5653_p1 }
  0x2f   : > { %p5659_p3 = pnand %p5657_p10, %p5654_p6 }
  0x31   : > { %5662 = shalt.err (!%p5659_p3)
}
  0x32   : > { %s5663_s22 = scalar_lea.vmem %s5868_s25, 512  ;;  %p5671_p12 = scmp.lt.s32.totalorder %s5868_s25, %s5868_s25 }
  0x33   : > { %p5664_p5 = scmp.ne.s32.totalorder %s5868_s25, %s5663_s22  ;;  %p5672_p0 = scmp.lt.s32.totalorder %s5663_s22, %s5663_s22 }
  0x35   : > { %p5666_p7 = pnand %p5664_p5, %p5624_p13  ;;  %p5673_p2 = por %p5672_p0, %p5671_p12 }
  0x37   : > { %p5667_p9 = pneg %p5666_p7 }
  0x39   : > { %p5674_p1 = pnand %p5673_p2, %p5667_p9 }
  0x3b   : > { %5677 = shalt.err (!%p5674_p1)
}
  0x3c   : > { %5421 = dma.hbm_to_vmem [thread:$0]  (!%p5864_p11), %s7064_s2, 512, %s5868_s25, [#allocation6], %s5782_s7, %s5782_s7, %s5783_s8  }
  0x3d   : > { %s5923_s4 = sadd.s32 1, %s5778_s15   ;;  %s27_s23 = sadd.s32 1, %s5774_s14 }
  0x3e   : > { %s24_s5 = ssub.s32 %s5778_s15, %s5923_s4  ;;  %p34_p13 = scmp.ne.s32.totalorder %s5774_s14, %s5770_s13 }
  0x3f   : > { %p25_p6 = scmp.eq.s32.totalorder %s24_s5, 0  ;;  %p35_p10 = scmp.eq.s32.totalorder %s5778_s15, 0 }
  0x40   : > { %p7101_p3 = scmp.eq.s32.totalorder %s5834_s16, 1  ;;  %p5432_p7 = scmp.lt.s32.totalorder %s5778_s15, 2 }
  0x41   : > { %s5939_s9 = scalar_select %p25_p6, %s5774_s14, %s27_s23  }
  0x42   : > { %p5933_p5 = por %p7101_p3, %p34_p13  ;;  %p36_p9 = por %p35_p10, %p34_p13 }
  0x43   : > { %s158_s10 = sand.u32 1, %s5774_s14   ;;  %s4873_s25 = sshll.u32 %s5778_s15, 7 }
  0x44   : > { %s7102_s6 = scalar_select %p5933_p5, 1, 0 }
  0x45   : > { %s4859_s11 = sshll.u32 %s158_s10, 3  ;;  %s5946_s17 = scalar_lea.hbm %s7062_s0, %s4873_s25 }
  0x46   : > { %s162_s21 = scalar_lea.vmem [#allocation2], %s4859_s11  ;;  %p5950_p11 = pnand %p5432_p7, %p36_p9 }
  0x47   : > { %s170_s24 = sshll.u32 %s162_s21, 4  ;;  %s159_s27 = scalar_lea.sflag [#allocation3], %s158_s10  ;;  %s5948_s24 = int_to_ptr.vmem [resolvable:$true] %s170_s24 }
  0x48   : > { %s5678_s28 = scalar_lea.hbm %s5946_s17, 128  ;;  %p5680_p0 = pneg %p5950_p11 }
  0x49   : > { %p5679_p12 = scmp.ne.s32.totalorder %s5946_s17, %s5678_s28  ;;  %s5683_s30 = scalar_lea.hbm %s7062_s0, 256 }
  0x4a   : > { %p5684_p13 = scmp.lt.u32.totalorder %s5946_s17, %s7062_s0  ;;  %p5685_p6 = scmp.lt.u32.totalorder %s5683_s30, %s5678_s28 }
  0x4b   : > { %p5681_p2 = pnand %p5680_p0, %p5679_p12  ;;  %p5687_p3 = scmp.lt.u32.totalorder %s5678_s28, %s5946_s17 }
  0x4c   : > { %p5686_p10 = por %p5685_p6, %p5684_p13 }
  0x4d   : > { %p5682_p1 = pneg %p5681_p2 }
  0x4e   : > { %p5688_p7 = por %p5687_p3, %p5686_p10 }
  0x50   : > { %p5689_p9 = pnand %p5688_p7, %p5682_p1 }
  0x52   : > { %5692 = shalt.err (!%p5689_p9)
}
  0x53   : > { %s5693_s10 = scalar_lea.vmem %s5948_s24, 128  ;;  %s5784_s11 = smov [#allocation2]  }
  0x54   : > { %p5694_p12 = scmp.ne.s32.totalorder %s5948_s24, %s5693_s10  ;;  %s5698_s25 = sshll.u32 %s5784_s11, 4  ;;  %s5699_s25 = int_to_ptr.vmem [resolvable:$false] %s5698_s25 }
  0x55   : > { %s5700_s7 = scalar_lea.vmem %s5699_s25, 256  ;;  %p5701_p4 = scmp.lt.s32.totalorder %s5948_s24, %s5699_s25 }
  0x56   : > { %p5696_p2 = pnand %p5694_p12, %p5680_p0  ;;  %p5702_p13 = scmp.lt.s32.totalorder %s5700_s7, %s5693_s10 }
  0x58   : > { %p5697_p5 = pneg %p5696_p2  ;;  %p5703_p6 = por %p5702_p13, %p5701_p4 }
  0x5a   : > { %p5704_p10 = pnand %p5703_p6, %p5697_p5 }
  0x5c   : > { %5707 = shalt.err (!%p5704_p10)
}
  0x5d   : > { %5425 = dma.hbm_to_vmem [thread:$0]  (!%p5950_p11), %s5946_s17, 128, %s5948_s24, %s159_s27  }
  0x5e   : > { %179 = sbr.rel (%p5853_p8) target bundleno = 1301 (0x515), region = 32 }
  0x65   : > { %s5982_s8 = sand.u32 1, %s5770_s13   ;;  %p7104_p4 = scmp.ne.s32.totalorder %s7097_s18, 0 }
  0x66   : > { %s4863_s21 = sshll.u32 %s5982_s8, 3  ;;  %s182_s28 = scalar_lea.sflag [#allocation3], %s5982_s8 }
  0x67   : > { %s5986_s22 = scalar_lea.vmem [#allocation2], %s4863_s21 }
  0x68   : > { %5753 = dma.done.wait (%p7104_p4), %s182_s28, 128  }
  0x69   : > { %5755 = vsyncadd (%p7104_p4), %s182_s28, 4294967168  ;;  %p7105_p5 = scmp.eq.s32.totalorder %s5834_s16, 0 }
  0x6b   : > { %5757 = dma.done.wait (%p7105_p5), [#allocation6], 2048   ;;  %p7106_p8 = pmov %p7105_p5 }
  0x6c   : > { %v5785_v0 = vmov 1   ;;  %v5786_v1 = vmov 0   ;;  %v218_v2 = vld [vmem:[#allocation7] sm:$0xff]  ;;  %v219_v3 = vld [vmem:[#allocation7 + $0x8] sm:$0xff]  ;;  %v220_v4 = vld [vmem:[#allocation7 + $0x10] sm:$0xff]  ;;  %v5787_v6 = vmov 2   ;;  %v7069_v8 = vlaneseq }
  0x6d   : > { %5759 = vsyncadd (%p7106_p8), [#allocation6], 4294965248  ;;  %5480 = vset.pattern.permute.xlu1 %v5785_v0  ;;  %5479 = vset.pattern.permute.xlu0 %v5786_v1  ;;  %v221_v5 = vld [vmem:[#allocation7 + $0x18] sm:$0xff]  ;;  %v5788_v7 = vmov 0.0   ;;  %v400_v12 = vld [vmem:[#allocation5] sm:$0xff]  ;;  %vm404_vm0 = vcmask 261120  }
  0x6e   : > { %284 = vperm.xlu1 %5480, %v218_v2   ;;  %228 = vperm.xlu0 %5479, %v218_v2   ;;  %v5999_v9 = vshrl.u32 %v7069_v8, 7  ;;  %v401_v13 = vld [vmem:[#allocation5 + $0x8] sm:$0xff]  ;;  %v4867_v16 = vld [vmem:[%s5986_s22 + $0x1] ss:$2 sm:$0xf]  ;;  %v406_v18 = vsel %vm404_vm0, %v400_v12, 0 }
  0x6f   : > { %489 = vmatprep.mubr.f32.mxu0 %v5788_v7  ;;  %1179 = vmatprep.mubr.f32.mxu1 %v5788_v7  ;;  %v409_v19 = vsel %vm404_vm0, %v401_v13, 0  ;;  %v223_v20 = vld [vmem:[%s5986_s22] ss:$2 sm:$0xf]  ;;  %v6011_v26 = vand.u32 4294901760, %v406_v18  ;;  %s4866_s18 = sshll.u32 %s5982_s8, 2 }
  0x70   : > { %7107 = vst [vmem:[#allocation12_spill] sm:$0xff] %v5999_v9  ;;  %v249_v14 = vsub.s32 0, %v5999_v9  ;;  %v253_v15 = vsub.s32 1, %v5999_v9  ;;  %v257_v17 = vsub.s32 2, %v5999_v9  ;;  %v402_v23 = vld [vmem:[#allocation5 + $0x10] sm:$0xff]  ;;  %v261_v24 = vsub.s32 3, %v5999_v9 }
  0x71   : > { %v6013_v27 = vand.u32 4294901760, %v409_v19  ;;  %v412_v31 = vsel %vm404_vm0, %v402_v23, 0  ;;  %v403_v32 = vld [vmem:[#allocation5 + $0x18] sm:$0xff]  ;;  %v6029_v39 = vsub.f32 %v406_v18, %v6011_v26  ;;  %s4874_s20 = sshll.u32 %s5834_s16, 6  ;;  %s215_s17 = scalar_lea.vmem [#allocation8], %s4866_s18 }
  0x72   : > { %288 = vperm.xlu1 %5480, %v219_v3   ;;  %233 = vperm.xlu0 %5479, %v219_v3   ;;  %v6009_v25 = vrot.slane %v4867_v16, %v249_v14  ;;  %v6015_v28 = vrot.slane %v4867_v16, %v253_v15  ;;  %v6017_v29 = vrot.slane %v4867_v16, %v257_v17  ;;  %v6034_v41 = vand.u32 4294901760, %v412_v31  ;;  %s4765_s24 = sshll.u32 %s215_s17, 4  ;;  %s7018_s29 = scalar_lea.hbm %s7065_s3, %s4874_s20  ;;  %s7020_s24 = int_to_ptr.vmem [resolvable:$true] %s4765_s24 }
  0x73   : > { %v250_v30 = vrot.slane %v223_v20, %v249_v14  ;;  %v254_v33 = vrot.slane %v223_v20, %v253_v15  ;;  %v6020_v34 = vrot.slane %v223_v20, %v257_v17  ;;  %v6022_v36 = vrot.slane %v4867_v16, %v261_v24  ;;  %s4751_s30 = scalar_lea.sflag [#allocation4], %s5982_s8  ;;  %s5708_s23 = scalar_lea.vmem %s7020_s24, 64 }
  0x74   : > { %v6024_v37 = vrot.slane %v223_v20, %v261_v24  ;;  %v6032_v40 = vsub.f32 %v409_v19, %v6013_v27  ;;  %v6037_v42 = vsel %vm404_vm0, %v403_v32, 0  ;;  %v6052_v61 = vand.u32 4294901760, %v6029_v39  ;;  %p5709_p11 = scmp.ne.s32.totalorder %s7020_s24, %s5708_s23  ;;  %p7137_p0 = scmp.ne.s32.totalorder %s7102_s6, 0 }
  0x75   : > { %s5792_s16 = smov [#allocation8]  }
  0x76   : > { %5481 = vset.pattern.permute.xlu1 %v5786_v1  ;;  %238 = vperm.xlu0 %5479, %v220_v4   ;;  %v6055_v62 = vand.u32 4294901760, %v6032_v40  ;;  %v6058_v1 = vsub.f32 %v412_v31, %v6034_v41  ;;  %p5710_p1 = pnand %p5709_p11, %p7137_p0  ;;  %s5712_s5 = sshll.u32 %s5792_s16, 4  ;;  %s5713_s5 = int_to_ptr.vmem [resolvable:$false] %s5712_s5 }
  0x77   : > { %243 = vperm.xlu1 %5481, %v221_v5   ;;  %s5714_s10 = scalar_lea.vmem %s5713_s5, 128  ;;  %p5715_p7 = scmp.lt.s32.totalorder %s7020_s24, %s5713_s5 }
  0x78   : > { %p5711_p3 = pneg %p5710_p1  ;;  %p5716_p9 = scmp.lt.s32.totalorder %s5714_s10, %s5708_s23 }
  0x7a   : > { %5482 = vset.pattern.permute.xlu0 %v5785_v0  ;;  %p5717_p12 = por %p5716_p9, %p5715_p7 }
  0x7b   : > { %5483 = vset.pattern.permute.xlu1 %v5785_v0  ;;  %292 = vperm.xlu0 %5482, %v220_v4  }
  0x7c   : > { %296 = vperm.xlu1 %5483, %v221_v5   ;;  %p5718_p2 = pnand %p5717_p12, %p5711_p3 }
  0x7f   : > { %5485 = vset.pattern.permute.xlu0 %v5787_v6 }
  0x80   : > { %5484 = vset.pattern.permute.xlu1 %v5787_v6  ;;  %357 = vperm.xlu0 %5485, %v219_v3  }
  0x81   : > { %353 = vperm.xlu1 %5484, %v218_v2   ;;  %v6061_v2 = vand.u32 4294901760, %v6037_v42 }
  0x85   : > { %361 = vperm.xlu1 %5484, %v220_v4  }
  0x89   : > { %365 = vperm.xlu1 %5484, %v221_v5  }
  0xed   : > { %v285_v10 = vpop.permute.xlu1 %284  ;;  %v229_v11 = vpop.permute.xlu0 %228 }
  0xee   : > { %v320_v43 = vmul.f32 %v6009_v25, %v285_v10  ;;  %v321_v44 = vmul.f32 %v6015_v28, %v285_v10  ;;  %v322_v45 = vmul.f32 %v6017_v29, %v285_v10  ;;  %v267_v46 = vmul.f32 %v250_v30, %v229_v11 }
  0xef   : > { %v268_v47 = vmul.f32 %v254_v33, %v229_v11  ;;  %v269_v48 = vmul.f32 %v6020_v34, %v229_v11  ;;  %v323_v56 = vmul.f32 %v6022_v36, %v285_v10  ;;  %v270_v57 = vmul.f32 %v6024_v37, %v229_v11 }
  0xf0   : > { %v336_v63 = vadd.f32 %v320_v43, %v267_v46 }
  0xf1   : > { %v289_v21 = vpop.permute.xlu1 %288  ;;  %v234_v22 = vpop.permute.xlu0 %233  ;;  %v337_v0 = vadd.f32 %v321_v44, %v268_v47  ;;  %v338_v6 = vadd.f32 %v322_v45, %v269_v48  ;;  %v339_v14 = vadd.f32 %v323_v56, %v270_v57 }
  0xf2   : > { %v324_v49 = vmul.f32 %v6009_v25, %v289_v21  ;;  %v325_v50 = vmul.f32 %v6015_v28, %v289_v21  ;;  %v326_v51 = vmul.f32 %v6017_v29, %v289_v21  ;;  %v271_v52 = vmul.f32 %v250_v30, %v234_v22 }
  0xf3   : > { %v272_v53 = vmul.f32 %v254_v33, %v234_v22  ;;  %v273_v54 = vmul.f32 %v6020_v34, %v234_v22  ;;  %v327_v58 = vmul.f32 %v6022_v36, %v289_v21  ;;  %v274_v59 = vmul.f32 %v6024_v37, %v234_v22 }
  0xf4   : > { %v340_v3 = vadd.f32 %v324_v49, %v271_v52 }
  0xf5   : > { %v239_v35 = vpop.permute.xlu0 %238  ;;  %v341_v4 = vadd.f32 %v325_v50, %v272_v53  ;;  %v342_v5 = vadd.f32 %v326_v51, %v273_v54  ;;  %v343_v12 = vadd.f32 %v327_v58, %v274_v59 }
  0xf6   : > { %v6026_v38 = vpop.permute.xlu1 %243  ;;  %v275_v10 = vmul.f32 %v250_v30, %v239_v35  ;;  %v276_v11 = vmul.f32 %v254_v33, %v239_v35  ;;  %v277_v20 = vmul.f32 %v6020_v34, %v239_v35  ;;  %v278_v21 = vmul.f32 %v6024_v37, %v239_v35 }
  0xf7   : > { %v279_v24 = vmul.f32 %v250_v30, %v6026_v38  ;;  %v280_v43 = vmul.f32 %v254_v33, %v6026_v38  ;;  %v282_v58 = vmul.f32 %v6024_v37, %v6026_v38  ;;  %v6085_v37 = vsub.f32 %v6037_v42, %v6061_v2 }
  0xfa   : > { %v293_v55 = vpop.permute.xlu0 %292 }
  0xfb   : > { %v297_v60 = vpop.permute.xlu1 %296  ;;  %v328_v15 = vmul.f32 %v6009_v25, %v293_v55  ;;  %v329_v22 = vmul.f32 %v6015_v28, %v293_v55  ;;  %v330_v31 = vmul.f32 %v6017_v29, %v293_v55  ;;  %v331_v44 = vmul.f32 %v6022_v36, %v293_v55 }
  0xfc   : > { %v332_v46 = vmul.f32 %v6009_v25, %v297_v60  ;;  %v333_v49 = vmul.f32 %v6015_v28, %v297_v60  ;;  %v334_v51 = vmul.f32 %v6017_v29, %v297_v60  ;;  %v335_v53 = vmul.f32 %v6022_v36, %v297_v60 }
  0xfd   : > { %v344_v48 = vadd.f32 %v328_v15, %v275_v10  ;;  %v345_v50 = vadd.f32 %v329_v22, %v276_v11  ;;  %v346_v52 = vadd.f32 %v330_v31, %v277_v20  ;;  %v347_v54 = vadd.f32 %v331_v44, %v278_v21 }
  0xfe   : > { %v281_v25 = vmul.f32 %v6020_v34, %v6026_v38  ;;  %v348_v57 = vadd.f32 %v332_v46, %v279_v24  ;;  %v349_v59 = vadd.f32 %v333_v49, %v280_v43  ;;  %v493_v36 = vsub.f32 %v6029_v39, %v6052_v61 }
  0xff   : > { %v358_v13 = vpop.permute.xlu0 %357  ;;  %v351_v60 = vadd.f32 %v335_v53, %v282_v58  ;;  %v504_v34 = vsub.f32 %v6032_v40, %v6055_v62  ;;  %v6088_v11 = vand.u32 4294901760, %v6058_v1  ;;  %v6099_v21 = vand.u32 4294901760, %v6085_v37 }
 0x100   : > { %v372_v16 = vadd.f32 %v358_v13, %v340_v3  ;;  %v373_v17 = vadd.f32 %v358_v13, %v341_v4  ;;  %v374_v18 = vadd.f32 %v358_v13, %v342_v5  ;;  %v354_v19 = vpop.permute.xlu1 %353  ;;  %v375_v23 = vadd.f32 %v358_v13, %v343_v12 }
 0x101   : > { %v368_v32 = vadd.f32 %v354_v19, %v336_v63  ;;  %v369_v45 = vadd.f32 %v354_v19, %v337_v0  ;;  %v370_v47 = vadd.f32 %v354_v19, %v338_v6  ;;  %v371_v30 = vadd.f32 %v354_v19, %v339_v14 }
 0x102   : > { %5490 = vtanh.f32 %v372_v16  ;;  %v350_v63 = vadd.f32 %v334_v51, %v281_v25  ;;  %v6090_v14 = vand.u32 4294901760, %v493_v36  ;;  %v515_v31 = vsub.f32 %v6058_v1, %v6088_v11 }
 0x103   : > { %5492 = vtanh.f32 %v373_v17 }
 0x104   : > { %5494 = vtanh.f32 %v374_v18  ;;  %v362_v35 = vpop.permute.xlu1 %361  ;;  %v6094_v18 = vand.u32 4294901760, %v504_v34 }
 0x105   : > { %5496 = vtanh.f32 %v375_v23  ;;  %v376_v33 = vadd.f32 %v362_v35, %v344_v48  ;;  %v377_v55 = vadd.f32 %v362_v35, %v345_v50  ;;  %v378_v56 = vadd.f32 %v362_v35, %v346_v52 }
 0x106   : > { %5498 = vtanh.f32 %v368_v32  ;;  %v379_v29 = vadd.f32 %v362_v35, %v347_v54 }
 0x107   : > { %5500 = vtanh.f32 %v369_v45 }
 0x108   : > { %5502 = vtanh.f32 %v370_v47  ;;  %v366_v28 = vpop.permute.xlu1 %365 }
 0x109   : > { %5504 = vtanh.f32 %v371_v30  ;;  %v380_v0 = vadd.f32 %v366_v28, %v348_v57  ;;  %v381_v3 = vadd.f32 %v366_v28, %v349_v59  ;;  %v382_v5 = vadd.f32 %v366_v28, %v350_v63 }
 0x10a   : > { %5506 = vtanh.f32 %v376_v33  ;;  %v383_v6 = vadd.f32 %v366_v28, %v351_v60 }
 0x10b   : > { %5508 = vtanh.f32 %v377_v55 }
 0x10c   : > { %v5491_v4 = vpop.eup %5490  ;;  %5510 = vtanh.f32 %v378_v56 }
 0x10d   : > { %v5493_v38 = vpop.eup %5492  ;;  %5512 = vtanh.f32 %v379_v29  ;;  %v423_v10 = vand.u32 4294901760, %v5491_v4 }
 0x10e   : > { %v5495_v12 = vpop.eup %5494  ;;  %5514 = vtanh.f32 %v380_v0  ;;  %v421_v13 = vand.u32 4294901760, %v5493_v38 }
 0x10f   : > { %v5497_v15 = vpop.eup %5496  ;;  %5516 = vtanh.f32 %v381_v3  ;;  %v6092_v16 = vsub.f32 %v5491_v4, %v423_v10  ;;  %v1113_v17 = vand.u32 4294901760, %v5495_v12 }
 0x110   : > { %v5499_v42 = vpop.eup %5498  ;;  %5518 = vtanh.f32 %v382_v5  ;;  %v6096_v19 = vsub.f32 %v5493_v38, %v421_v13  ;;  %v1111_v20 = vand.u32 4294901760, %v5497_v15 }
 0x111   : > { %v5501_v22 = vpop.eup %5500  ;;  %5520 = vtanh.f32 %v383_v6  ;;  %v419_v23 = vand.u32 4294901760, %v5499_v42  ;;  %v7070_v24 = vand.u32 4294901760, %v6092_v16  ;;  %v6106_v45 = vsub.f32 %v5495_v12, %v1113_v17 }
 0x112   : > { %v5503_v32 = vpop.eup %5502  ;;  %v417_v43 = vand.u32 4294901760, %v5501_v22  ;;  %v6104_v44 = vsub.f32 %v5497_v15, %v1111_v20  ;;  %v548_v46 = vand.u32 4294901760, %v6096_v19 }
 0x113   : > { %v5505_v47 = vpop.eup %5504  ;;  %v6109_v35 = vpack.c.bf16 %v423_v10, %v419_v23  ;;  %v6111_v48 = vsub.f32 %v5499_v42, %v419_v23  ;;  %v1109_v49 = vand.u32 4294901760, %v5503_v32  ;;  %v6116_v30 = vsub.f32 %v6092_v16, %v7070_v24 }
 0x114   : > { %v5507_v50 = vpop.eup %5506  ;;  %v6118_v51 = vpack.c.bf16 %v421_v13, %v417_v43  ;;  %v6120_v52 = vsub.f32 %v5501_v22, %v417_v43  ;;  %v1107_v33 = vand.u32 4294901760, %v5505_v47  ;;  %v549_v53 = vsub.f32 %v6096_v19, %v548_v46 }
 0x115   : > { %v5509_v54 = vpop.eup %5508  ;;  %v6125_v55 = vpack.c.bf16 %v1113_v17, %v1109_v49  ;;  %v6127_v25 = vsub.f32 %v5503_v32, %v1109_v49  ;;  %v427_v56 = vand.u32 4294901760, %v5507_v50  ;;  %v1238_v57 = vand.u32 4294901760, %v6104_v44 }
 0x116   : > { %v5511_v28 = vpop.eup %5510  ;;  %4876 = vmatprep.subr.bf16.mxu0 %v6118_v51  ;;  %v6131_v58 = vpack.c.bf16 %v1111_v20, %v1107_v33  ;;  %v6133_v29 = vsub.f32 %v5505_v47, %v1107_v33  ;;  %v425_v59 = vand.u32 4294901760, %v5509_v54  ;;  %v536_v63 = vand.u32 4294901760, %v6120_v52 }
 0x117   : > { %v5513_v0 = vpop.eup %5512  ;;  %4878 = vmatpush1.bf16.msra.mxu0 %v6109_v35  ;;  %v6137_v36 = vsub.f32 %v5507_v50, %v427_v56  ;;  %v1117_v60 = vand.u32 4294901760, %v5511_v28  ;;  %v550_v3 = vand.u32 4294901760, %v549_v53  ;;  %v1239_v34 = vsub.f32 %v6104_v44, %v1238_v57 }
 0x118   : > { %v5515_v4 = vpop.eup %5514  ;;  %4924 = vmatprep.subr.bf16.mxu1 %v6131_v58  ;;  %v6143_v5 = vsub.f32 %v5509_v54, %v425_v59  ;;  %v1115_v38 = vand.u32 4294901760, %v5513_v0  ;;  %v537_v6 = vsub.f32 %v6120_v52, %v536_v63  ;;  %v1226_v10 = vand.u32 4294901760, %v6133_v29 }
 0x119   : > { %v5517_v12 = vpop.eup %5516  ;;  %4926 = vmatpush1.bf16.msra.mxu1 %v6125_v55  ;;  %v431_v13 = vand.u32 4294901760, %v5515_v4  ;;  %v6150_v15 = vsub.f32 %v5511_v28, %v1117_v60  ;;  %v1240_v17 = vand.u32 4294901760, %v1239_v34  ;;  %v7071_v42 = vand.u32 4294901760, %v6111_v48 }
 0x11a   : > { %v5519_v20 = vpop.eup %5518  ;;  %v429_v22 = vand.u32 4294901760, %v5517_v12  ;;  %v6153_v23 = vsub.f32 %v5513_v0, %v1115_v38  ;;  %v538_v32 = vand.u32 4294901760, %v537_v6  ;;  %v1227_v43 = vsub.f32 %v6133_v29, %v1226_v10 }
 0x11b   : > { %v5521_v47 = vpop.eup %5520  ;;  %v6158_v49 = vpack.c.bf16 %v431_v13, %v427_v56  ;;  %v6160_v50 = vsub.f32 %v5515_v4, %v431_v13  ;;  %v1121_v33 = vand.u32 4294901760, %v5519_v20  ;;  %v543_v53 = vsub.f32 %v6111_v48, %v7071_v42 }
 0x11c   : > { %v6165_v54 = vpack.c.bf16 %v429_v22, %v425_v59  ;;  %v6167_v28 = vsub.f32 %v5517_v12, %v429_v22  ;;  %v1119_v0 = vand.u32 4294901760, %v5521_v47  ;;  %v4883_v34 = vpack.c.bf16 %v550_v3, %v538_v32 }
 0x11d   : > { %v6169_v6 = vpack.c.bf16 %v1121_v33, %v1117_v60  ;;  %v6171_v8 = vsub.f32 %v5519_v20, %v1121_v33  ;;  %v1228_v24 = vand.u32 4294901760, %v1227_v43  ;;  %v544_v56 = vand.u32 4294901760, %v543_v53 }
 0x11e   : > { %4880 = vmatprep.subr.bf16.mxu0 %v6165_v54  ;;  %v6174_v4 = vpack.c.bf16 %v1119_v0, %v1115_v38  ;;  %v6176_v13 = vsub.f32 %v5521_v47, %v1119_v0  ;;  %v556_v42 = vand.u32 4294901760, %v6116_v30  ;;  %v1232_v59 = vand.u32 4294901760, %v6127_v25 }
 0x11f   : > { %4882 = vmatpush1.bf16.msra.mxu0 %v6158_v49  ;;  %v4931_v12 = vpack.c.bf16 %v1240_v17, %v1228_v24  ;;  %v7077_v60 = vand.u32 4294901760, %v6106_v45  ;;  %v7075_v3 = vand.u32 4294901760, %v6143_v5  ;;  %v7072_v20 = vand.u32 4294901760, %v6167_v28 }
 0x120   : > { %4928 = vmatprep.subr.bf16.mxu1 %v6174_v4  ;;  %4884 = vmatprep.subr.bf16.mxu0 %v4883_v34  ;;  %v4885_v38 = vpack.c.bf16 %v556_v42, %v544_v56  ;;  %v1233_v22 = vsub.f32 %v6127_v25, %v1232_v59  ;;  %v7073_v30 = vand.u32 4294901760, %v6153_v23  ;;  %v7074_v32 = vand.u32 4294901760, %v6176_v13 }
 0x121   : > { %4930 = vmatpush1.bf16.msra.mxu1 %v6169_v6  ;;  %v1245_v24 = vsub.f32 %v6106_v45, %v7077_v60  ;;  %v561_v17 = vsub.f32 %v6143_v5, %v7075_v3  ;;  %v573_v42 = vsub.f32 %v6167_v28, %v7072_v20  ;;  %v7076_v43 = vand.u32 4294901760, %v6137_v36 }
 0x122   : > { %4932 = vmatprep.subr.bf16.mxu1 %v4931_v12  ;;  %495 = vmatmul.mubr.f32.vlgmr.msra.gmra.mrb[0].mxu0 %v6090_v14  ;;  %v1234_v47 = vand.u32 4294901760, %v1233_v22  ;;  %v1251_v33 = vsub.f32 %v6153_v23, %v7073_v30  ;;  %v1263_v53 = vsub.f32 %v6176_v13, %v7074_v32  ;;  %v578_v0 = vand.u32 4294901760, %v6160_v50 }
 0x123   : > { %4886 = vmatpush1.bf16.msra.mxu0 %v4885_v38  ;;  %v1246_v34 = vand.u32 4294901760, %v1245_v24  ;;  %500 = vmatprep.mubr.f32.mxu0 %v5788_v7  ;;  %v562_v56 = vand.u32 4294901760, %v561_v17  ;;  %v574_v20 = vand.u32 4294901760, %v573_v42  ;;  %v567_v12 = vsub.f32 %v6137_v36, %v7076_v43 }
 0x124   : > { %1185 = vmatmul.mubr.f32.vlgmr.msra.gmra.mrb[0].mxu1 %v6090_v14  ;;  %v1252_v22 = vand.u32 4294901760, %v1251_v33  ;;  %v1264_v30 = vand.u32 4294901760, %v1263_v53  ;;  %v579_v32 = vsub.f32 %v6160_v50, %v578_v0  ;;  %v1256_v3 = vand.u32 4294901760, %v6150_v15 }
 0x125   : > { %v4933_v38 = vpack.c.bf16 %v1246_v34, %v1234_v47  ;;  %1190 = vmatprep.mubr.f32.mxu1 %v5788_v7  ;;  %v4887_v24 = vpack.c.bf16 %v574_v20, %v562_v56  ;;  %v1268_v17 = vand.u32 4294901760, %v6171_v8  ;;  %v568_v43 = vand.u32 4294901760, %v567_v12 }
 0x126   : > { %506 = vmatmul.mubr.f32.gmra.mrb[2].mxu0 %v6094_v18  ;;  %v4935_v42 = vpack.c.bf16 %v1264_v30, %v1252_v22  ;;  %v580_v60 = vand.u32 4294901760, %v579_v32  ;;  %v1257_v14 = vsub.f32 %v6150_v15, %v1256_v3  ;;  %v516_v20 = vand.u32 4294901760, %v515_v31 }
 0x127   : > { %4934 = vmatpush1.bf16.msra.mxu1 %v4933_v38  ;;  %4888 = vmatprep.subr.bf16.mxu0 %v4887_v24  ;;  %v1269_v47 = vsub.f32 %v6171_v8, %v1268_v17  ;;  %v526_v33 = vsub.f32 %v6085_v37, %v6099_v21  ;;  %v4891_v34 = vpack.c.bf16 %v6096_v19, %v6120_v52  ;;  %v7109_v19 = vand.u32 4294901760, %v6092_v16 }
 0x128   : > { %1196 = vmatmul.mubr.f32.gmra.mrb[2].mxu1 %v6094_v18  ;;  %4936 = vmatprep.subr.bf16.mxu1 %v4935_v42  ;;  %v4889_v30 = vpack.c.bf16 %v580_v60, %v568_v43  ;;  %v1258_v32 = vand.u32 4294901760, %v1257_v14  ;;  %v4939_v12 = vpack.c.bf16 %v6104_v44, %v6133_v29  ;;  %v4893_v18 = vpack.c.bf16 %v6092_v16, %v6111_v48 }
 0x129   : > { %v1270_v53 = vand.u32 4294901760, %v1269_v47  ;;  %511 = vmatprep.mubr.f32.mxu0 %v5788_v7  ;;  %1201 = vmatprep.mubr.f32.mxu1 %v5788_v7  ;;  %v527_v31 = vand.u32 4294901760, %v526_v33  ;;  %v4941_v60 = vpack.c.bf16 %v6106_v45, %v6127_v25  ;;  %v4895_v43 = vpack.c.bf16 %v6167_v28, %v6143_v5 }
 0x12a   : > { %4890 = vmatpush1.bf16.msra.mxu0 %v4889_v30  ;;  %v4943_v22 = vpack.c.bf16 %v6176_v13, %v6153_v23  ;;  %v4897_v38 = vpack.c.bf16 %v6160_v50, %v6137_v36  ;;  %v4945_v24 = vpack.c.bf16 %v6171_v8, %v6150_v15  ;;  %v4907_v42 = vpack.c.bf16 %v548_v46, %v536_v63  ;;  %v1814_v8 = vld [vmem:[#allocation5 + $0x20] sm:$0xff] }
 0x12b   : > { %v4937_v56 = vpack.c.bf16 %v1270_v53, %v1258_v32  ;;  %4892 = vmatprep.subr.bf16.mxu0 %v4891_v34  ;;  %517 = vmatmul.mubr.f32.gmra.mrb[4].mxu0 %v516_v20  ;;  %v7111_v52 = vand.u32 4294901760, %v6143_v5  ;;  %v7114_v16 = vand.u32 4294901760, %v6176_v13 }
 0x12c   : > { %1207 = vmatmul.mubr.f32.gmra.mrb[4].mxu1 %v516_v20  ;;  %522 = vmatprep.mubr.f32.mxu0 %v5788_v7 }
 0x12d   : > { %4938 = vmatpush1.bf16.msra.mxu1 %v4937_v56  ;;  %1212 = vmatprep.mubr.f32.mxu1 %v5788_v7 }
 0x12e   : > { %4940 = vmatprep.subr.bf16.mxu1 %v4939_v12 }
 0x12f   : > { %528 = vmatmul.mubr.f32.gmra.mrb[6].mxu0 %v527_v31 }
 0x130   : > { %1218 = vmatmul.mubr.f32.gmra.mrb[6].mxu1 %v527_v31  ;;  %638 = vmatprep.mubr.f32.mxu0 %v5788_v7 }
 0x131   : > { %1328 = vmatprep.mubr.f32.mxu1 %v5788_v7 }
 0x133   : > { %640 = vmatmul.mubr.f32.vlgmr.msra.gmra.mrb[0].mxu0 %v6011_v26 }
 0x134   : > { %4894 = vmatpush1.bf16.msra.mxu0 %v4893_v18  ;;  %1330 = vmatmul.mubr.f32.vlgmr.msra.gmra.mrb[0].mxu1 %v6011_v26 }
 0x135   : > { %4942 = vmatpush1.bf16.msra.mxu1 %v4941_v60  ;;  %4896 = vmatprep.subr.bf16.mxu0 %v4895_v43 }
 0x136   : > { %4944 = vmatprep.subr.bf16.mxu1 %v4943_v22  ;;  %645 = vmatprep.mubr.f32.mxu0 %v5788_v7 }
 0x137   : > { %1335 = vmatprep.mubr.f32.mxu1 %v5788_v7  ;;  %647 = vmatmul.mubr.f32.gmra.mrb[2].mxu0 %v6013_v27 }
 0x138   : > { %4898 = vmatpush1.bf16.msra.mxu0 %v4897_v38  ;;  %1337 = vmatmul.mubr.f32.gmra.mrb[2].mxu1 %v6013_v27 }
 0x139   : > { %4946 = vmatpush1.bf16.msra.mxu1 %v4945_v24  ;;  %4900 = vmatprep.subr.bf16.mxu0 %v6118_v51 }
 0x13a   : > { %4948 = vmatprep.subr.bf16.mxu1 %v6131_v58  ;;  %652 = vmatprep.mubr.f32.mxu0 %v5788_v7 }
 0x13b   : > { %1342 = vmatprep.mubr.f32.mxu1 %v5788_v7  ;;  %654 = vmatmul.mubr.f32.gmra.mrb[4].mxu0 %v6034_v41 }
 0x13c   : > { %1344 = vmatmul.mubr.f32.gmra.mrb[4].mxu1 %v6034_v41  ;;  %659 = vmatprep.mubr.f32.mxu0 %v5788_v7 }
 0x13d   : > { %1349 = vmatprep.mubr.f32.mxu1 %v5788_v7 }
 0x13f   : > { %661 = vmatmul.mubr.f32.gmra.mrb[6].mxu0 %v6061_v2 }
 0x140   : > { %1351 = vmatmul.mubr.f32.gmra.mrb[6].mxu1 %v6061_v2  ;;  %747 = vmatprep.mubr.f32.mxu0 %v5788_v7 }
 0x141   : > { %1437 = vmatprep.mubr.f32.mxu1 %v5788_v7 }
 0x143   : > { %750 = vmatmul.mubr.f32.vlgmr.msra.gmra.mrb[0].mxu0 %v6029_v39 }
 0x144   : > { %4902 = vmatpush1.bf16.msra.mxu0 %v6109_v35  ;;  %1440 = vmatmul.mubr.f32.vlgmr.msra.gmra.mrb[0].mxu1 %v6029_v39  ;;  %v4955_v39 = vpack.c.bf16 %v1238_v57, %v1226_v10 }
 0x145   : > { %4950 = vmatpush1.bf16.msra.mxu1 %v6125_v55  ;;  %4904 = vmatprep.subr.bf16.mxu0 %v6165_v54 }
 0x146   : > { %4952 = vmatprep.subr.bf16.mxu1 %v6174_v4  ;;  %755 = vmatprep.mubr.f32.mxu0 %v5788_v7 }
 0x147   : > { %1445 = vmatprep.mubr.f32.mxu1 %v5788_v7  ;;  %758 = vmatmul.mubr.f32.gmra.mrb[2].mxu0 %v6032_v40 }
 0x148   : > { %4906 = vmatpush1.bf16.msra.mxu0 %v6158_v49  ;;  %1448 = vmatmul.mubr.f32.gmra.mrb[2].mxu1 %v6032_v40  ;;  %v7108_v40 = vand.u32 4294901760, %v6111_v48  ;;  %v7113_v48 = vand.u32 4294901760, %v6153_v23 }
 0x149   : > { %4954 = vmatpush1.bf16.msra.mxu1 %v6169_v6  ;;  %4908 = vmatprep.subr.bf16.mxu0 %v4907_v42 }
 0x14a   : > { %4956 = vmatprep.subr.bf16.mxu1 %v4955_v39  ;;  %763 = vmatprep.mubr.f32.mxu0 %v5788_v7  ;;  %v4909_v44 = vpack.c.bf16 %v7109_v19, %v7108_v40  ;;  %v4959_v29 = vpack.c.bf16 %v7114_v16, %v7113_v48 }
 0x14b   : > { %1453 = vmatprep.mubr.f32.mxu1 %v5788_v7  ;;  %766 = vmatmul.mubr.f32.gmra.mrb[4].mxu0 %v6058_v1 }
 0x14c   : > { %1456 = vmatmul.mubr.f32.gmra.mrb[4].mxu1 %v6058_v1  ;;  %771 = vmatprep.mubr.f32.mxu0 %v5788_v7  ;;  %v7110_v1 = vand.u32 4294901760, %v6106_v45  ;;  %v7115_v45 = vand.u32 4294901760, %v6137_v36 }
 0x14d   : > { %1461 = vmatprep.mubr.f32.mxu1 %v5788_v7 }
 0x14e   : > { %v4957_v46 = vpack.c.bf16 %v7110_v1, %v1232_v59  ;;  %v4913_v25 = vpack.c.bf16 %v578_v0, %v7115_v45 }
 0x14f   : > { %774 = vmatmul.mubr.f32.gmra.mrb[6].mxu0 %v6085_v37 }
 0x150   : > { %1464 = vmatmul.mubr.f32.gmra.mrb[6].mxu1 %v6085_v37  ;;  %852 = vmatprep.mubr.f32.mxu0 %v5788_v7  ;;  %v7112_v37 = vand.u32 4294901760, %v6167_v28 }
 0x151   : > { %1542 = vmatprep.mubr.f32.mxu1 %v5788_v7 }
 0x152   : > { %v4911_v57 = vpack.c.bf16 %v7112_v37, %v7111_v52 }
 0x153   : > { %856 = vmatmul.mubr.f32.vlgmr.msra.gmra.mrb[0].mxu0 %v6052_v61 }
 0x154   : > { %4910 = vmatpush1.bf16.msra.mxu0 %v4909_v44  ;;  %1546 = vmatmul.mubr.f32.vlgmr.msra.gmra.mrb[0].mxu1 %v6052_v61  ;;  %v4961_v61 = vpack.c.bf16 %v1268_v17, %v1256_v3 }
 0x155   : > { %4958 = vmatpush1.bf16.msra.mxu1 %v4957_v46  ;;  %4912 = vmatprep.subr.bf16.mxu0 %v4911_v57 }
 0x156   : > { %4960 = vmatprep.subr.bf16.mxu1 %v4959_v29  ;;  %861 = vmatprep.mubr.f32.mxu0 %v5788_v7 }
 0x157   : > { %1551 = vmatprep.mubr.f32.mxu1 %v5788_v7  ;;  %865 = vmatmul.mubr.f32.gmra.mrb[2].mxu0 %v6055_v62 }
 0x158   : > { %4914 = vmatpush1.bf16.msra.mxu0 %v4913_v25  ;;  %1555 = vmatmul.mubr.f32.gmra.mrb[2].mxu1 %v6055_v62  ;;  %v1816_v62 = vld [vmem:[#allocation5 + $0x30] sm:$0xff] }
 0x159   : > { %4962 = vmatpush1.bf16.msra.mxu1 %v4961_v61  ;;  %4916 = vmatprep.subr.bf16.mxu0 %v6118_v51 }
 0x15a   : > { %4964 = vmatprep.subr.bf16.mxu1 %v6131_v58  ;;  %870 = vmatprep.mubr.f32.mxu0 %v5788_v7 }
 0x15b   : > { %1560 = vmatprep.mubr.f32.mxu1 %v5788_v7  ;;  %874 = vmatmul.mubr.f32.gmra.mrb[4].mxu0 %v6088_v11 }
 0x15c   : > { %1564 = vmatmul.mubr.f32.gmra.mrb[4].mxu1 %v6088_v11  ;;  %879 = vmatprep.mubr.f32.mxu0 %v5788_v7 }
 0x15d   : > { %1569 = vmatprep.mubr.f32.mxu1 %v5788_v7 }
 0x15f   : > { %883 = vmatmul.mubr.f32.gmra.mrb[6].mxu0 %v6099_v21 }
 0x160   : > { %1573 = vmatmul.mubr.f32.gmra.mrb[6].mxu1 %v6099_v21  ;;  %977 = vmatprep.mubr.f32.mxu0 %v5788_v7  ;;  %v1825_v21 = vsel %vm404_vm0, %v1816_v62, 0 }
 0x161   : > { %1667 = vmatprep.mubr.f32.mxu1 %v5788_v7 }
 0x163   : > { %979 = vmatmul.mubr.f32.vlgmr.msra.gmra.mrb[0].mxu0 %v6011_v26 }
 0x164   : > { %4918 = vmatpush1.bf16.msra.mxu0 %v6109_v35  ;;  %1669 = vmatmul.mubr.f32.vlgmr.msra.gmra.mrb[0].mxu1 %v6011_v26  ;;  %v1817_v35 = vld [vmem:[#allocation5 + $0x38] sm:$0xff] }
 0x165   : > { %4966 = vmatpush1.bf16.msra.mxu1 %v6125_v55  ;;  %4920 = vmatprep.subr.bf16.mxu0 %v6165_v54  ;;  %v1828_v58 = vsel %vm404_vm0, %v1817_v35, 0 }
 0x166   : > { %4968 = vmatprep.subr.bf16.mxu1 %v6174_v4  ;;  %984 = vmatprep.mubr.f32.mxu0 %v5788_v7  ;;  %v6399_v23 = vand.u32 4294901760, %v1828_v58 }
 0x167   : > { %1674 = vmatprep.mubr.f32.mxu1 %v5788_v7  ;;  %986 = vmatmul.mubr.f32.gmra.mrb[2].mxu0 %v6013_v27 }
 0x168   : > { %4922 = vmatpush1.bf16.msra.mxu0 %v6158_v49  ;;  %1676 = vmatmul.mubr.f32.gmra.mrb[2].mxu1 %v6013_v27  ;;  %v6411_v59 = vsub.f32 %v1828_v58, %v6399_v23 }
 0x169   : > { %4970 = vmatpush1.bf16.msra.mxu1 %v6169_v6  ;;  %991 = vmatprep.mubr.f32.mxu0 %v5788_v7 }
 0x16a   : > { %1681 = vmatprep.mubr.f32.mxu1 %v5788_v7  ;;  %v6421_v32 = vand.u32 4294901760, %v6411_v59 }
 0x16b   : > { %993 = vmatmul.mubr.f32.gmra.mrb[4].mxu0 %v6034_v41 }
 0x16c   : > { %1683 = vmatmul.mubr.f32.gmra.mrb[4].mxu1 %v6034_v41  ;;  %998 = vmatprep.mubr.f32.mxu0 %v5788_v7 }
 0x16d   : > { %1688 = vmatprep.mubr.f32.mxu1 %v5788_v7 }
 0x16f   : > { %1000 = vmatmul.mubr.f32.gmra.mrb[6].mxu0 %v6061_v2 }
 0x170   : > { %1690 = vmatmul.mubr.f32.gmra.mrb[6].mxu1 %v6061_v2  ;;  %1078 = vmatprep.mubr.f32.mxu0 %v5788_v7 }
 0x171   : > { %1768 = vmatprep.mubr.f32.mxu1 %v5788_v7 }
 0x173   : > { %1080 = vmatmul.mubr.f32.vlgmr.msra.gmra.mrb[0].mxu0 %v6011_v26 }
 0x174   : > { %1770 = vmatmul.mubr.f32.vlgmr.msra.gmra.mrb[0].mxu1 %v6011_v26  ;;  %1085 = vmatprep.mubr.f32.mxu0 %v5788_v7  ;;  %v1815_v26 = vld [vmem:[#allocation5 + $0x28] sm:$0xff] }
 0x175   : > { %1775 = vmatprep.mubr.f32.mxu1 %v5788_v7  ;;  %v1822_v11 = vsel %vm404_vm0, %v1815_v26, 0 }
 0x176   : > { %v6388_v51 = vand.u32 4294901760, %v1822_v11 }
 0x177   : > { %1087 = vmatmul.mubr.f32.gmra.mrb[2].mxu0 %v6013_v27 }
 0x178   : > { %1777 = vmatmul.mubr.f32.gmra.mrb[2].mxu1 %v6013_v27  ;;  %1092 = vmatprep.mubr.f32.mxu0 %v5788_v7  ;;  %v1819_v27 = vsel %vm404_vm0, %v1814_v8, 0  ;;  %v6397_v15 = vsub.f32 %v1822_v11, %v6388_v51 }
 0x179   : > { %1782 = vmatprep.mubr.f32.mxu1 %v5788_v7 }
 0x17a   : > { %v6408_v13 = vand.u32 4294901760, %v6397_v15 }
 0x17b   : > { %1094 = vmatmul.mubr.f32.gmra.mrb[4].mxu0 %v6034_v41 }
 0x17c   : > { %1784 = vmatmul.mubr.f32.gmra.mrb[4].mxu1 %v6034_v41  ;;  %1099 = vmatprep.mubr.f32.mxu0 %v5788_v7  ;;  %v6385_v41 = vand.u32 4294901760, %v1819_v27  ;;  %v1917_v33 = vsub.f32 %v6397_v15, %v6408_v13 }
 0x17d   : > { %1789 = vmatprep.mubr.f32.mxu1 %v5788_v7 }
 0x17e   : > { %v6394_v5 = vsub.f32 %v1819_v27, %v6385_v41  ;;  %v6429_v40 = vand.u32 4294901760, %v1917_v33 }
 0x17f   : > { %1101 = vmatmul.mubr.f32.gmra.mrb[6].mxu0 %v6061_v2 }
 0x180   : > { %1791 = vmatmul.mubr.f32.gmra.mrb[6].mxu1 %v6061_v2  ;;  %1902 = vmatprep.mubr.f32.mxu0 %v5788_v7  ;;  %v6390_v2 = vand.u32 4294901760, %v1825_v21  ;;  %v6405_v6 = vand.u32 4294901760, %v6394_v5 }
 0x181   : > { %2592 = vmatprep.mubr.f32.mxu1 %v5788_v7 }
 0x182   : > { %v6402_v50 = vsub.f32 %v1825_v21, %v6390_v2  ;;  %v1906_v47 = vsub.f32 %v6394_v5, %v6405_v6 }
 0x184   : > { %v6414_v0 = vand.u32 4294901760, %v6402_v50  ;;  %v6425_v22 = vand.u32 4294901760, %v1906_v47 }
 0x186   : > { %7116 = vst [vmem:[#allocation13_spill] sm:$0xff] %v6414_v0  ;;  %v1928_v31 = vsub.f32 %v6402_v50, %v6414_v0 }
 0x188   : > { %v6437_v48 = vand.u32 4294901760, %v1928_v31 }
 0x246   : > { %v1081_v55 = vpop.f32.mrb[0].mxu0 }
 0x247   : > { %5522 = vtanh.f32 %v1081_v55  ;;  %v1771_v63 = vpop.f32.mrb[0].mxu1  ;;  %v1083_v36 = vpop.f32.mrb[1].mxu0 }
 0x248   : > { %5524 = vtanh.f32 %v1771_v63  ;;  %v1773_v10 = vpop.f32.mrb[1].mxu1 }
 0x249   : > { %5526 = vtanh.f32 %v1083_v36 }
 0x24a   : > { %5528 = vtanh.f32 %v1773_v10  ;;  %v1088_v49 = vpop.f32.mrb[2].mxu0 }
 0x24b   : > { %5530 = vtanh.f32 %v1088_v49  ;;  %v1778_v54 = vpop.f32.mrb[2].mxu1  ;;  %v1090_v28 = vpop.f32.mrb[3].mxu0 }
 0x24c   : > { %5532 = vtanh.f32 %v1778_v54  ;;  %v1780_v4 = vpop.f32.mrb[3].mxu1 }
 0x24d   : > { %5534 = vtanh.f32 %v1090_v28 }
 0x24e   : > { %5536 = vtanh.f32 %v1780_v4  ;;  %v1095_v3 = vpop.f32.mrb[4].mxu0 }
 0x24f   : > { %5538 = vtanh.f32 %v1095_v3  ;;  %v1785_v17 = vpop.f32.mrb[4].mxu1  ;;  %v1097_v14 = vpop.f32.mrb[5].mxu0 }
 0x250   : > { %5540 = vtanh.f32 %v1785_v17  ;;  %v1787_v20 = vpop.f32.mrb[5].mxu1 }
 0x251   : > { %v5523_v30 = vpop.eup %5522  ;;  %5542 = vtanh.f32 %v1097_v14 }
 0x252   : > { %v5525_v53 = vpop.eup %5524  ;;  %5544 = vtanh.f32 %v1787_v20  ;;  %v1102_v34 = vpop.f32.mrb[6].mxu0  ;;  %v1832_v56 = vand.u32 4294901760, %v5523_v30 }
 0x253   : > { %v5527_v12 = vpop.eup %5526  ;;  %5546 = vtanh.f32 %v1102_v34  ;;  %v1792_v18 = vpop.f32.mrb[6].mxu1  ;;  %v2522_v43 = vand.u32 4294901760, %v5525_v53 }
 0x254   : > { %v1104_v60 = vpop.f32.mrb[7].mxu0  ;;  %v5529_v38 = vpop.eup %5528  ;;  %5548 = vtanh.f32 %v1792_v18  ;;  %v1830_v42 = vand.u32 4294901760, %v5527_v12  ;;  %v6427_v39 = vsub.f32 %v5523_v30, %v1832_v56 }
 0x255   : > { %v1794_v24 = vpop.f32.mrb[7].mxu1  ;;  %v5531_v19 = vpop.eup %5530  ;;  %5550 = vtanh.f32 %v1104_v60  ;;  %v2520_v44 = vand.u32 4294901760, %v5529_v38  ;;  %v6431_v1 = vsub.f32 %v5525_v53, %v2522_v43 }
 0x256   : > { %v5533_v52 = vpop.eup %5532  ;;  %5552 = vtanh.f32 %v1794_v24  ;;  %v6435_v37 = vsub.f32 %v5527_v12, %v1830_v42  ;;  %v1836_v57 = vand.u32 4294901760, %v5531_v19  ;;  %v7078_v25 = vand.u32 4294901760, %v6427_v39 }
 0x257   : > { %v5535_v16 = vpop.eup %5534  ;;  %v6439_v29 = vsub.f32 %v5529_v38, %v2520_v44  ;;  %v2526_v45 = vand.u32 4294901760, %v5533_v52  ;;  %v7083_v61 = vand.u32 4294901760, %v6431_v1 }
 0x258   : > { %v5537_v8 = vpop.eup %5536  ;;  %v1834_v26 = vand.u32 4294901760, %v5535_v16  ;;  %v6443_v27 = vpack.c.bf16 %v1836_v57, %v1832_v56  ;;  %v6445_v62 = vsub.f32 %v5531_v19, %v1836_v57  ;;  %v7082_v11 = vand.u32 4294901760, %v6435_v37 }
 0x259   : > { %v5539_v21 = vpop.eup %5538  ;;  %v2524_v35 = vand.u32 4294901760, %v5537_v8  ;;  %v6448_v55 = vpack.c.bf16 %v2526_v45, %v2522_v43  ;;  %v6450_v58 = vsub.f32 %v5533_v52, %v2526_v45  ;;  %v7080_v63 = vand.u32 4294901760, %v6439_v29 }
 0x25a   : > { %v5541_v36 = vpop.eup %5540  ;;  %v6453_v10 = vpack.c.bf16 %v1834_v26, %v1830_v42  ;;  %v6455_v49 = vsub.f32 %v5535_v16, %v1834_v26  ;;  %v1840_v54 = vand.u32 4294901760, %v5539_v21  ;;  %v1950_v28 = vsub.f32 %v6435_v37, %v7082_v11 }
 0x25b   : > { %v5543_v4 = vpop.eup %5542  ;;  %v6460_v3 = vpack.c.bf16 %v2524_v35, %v2520_v44  ;;  %v6462_v17 = vsub.f32 %v5537_v8, %v2524_v35  ;;  %v2530_v14 = vand.u32 4294901760, %v5541_v36  ;;  %v2640_v47 = vsub.f32 %v6439_v29, %v7080_v63 }
 0x25c   : > { %v5545_v20 = vpop.eup %5544  ;;  %4972 = vmatprep.subr.bf16.mxu0 %v6453_v10  ;;  %v1838_v33 = vand.u32 4294901760, %v5543_v4  ;;  %v6468_v30 = vsub.f32 %v5539_v21, %v1840_v54  ;;  %v1951_v53 = vand.u32 4294901760, %v1950_v28  ;;  %v7081_v34 = vand.u32 4294901760, %v6455_v49 }
 0x25d   : > { %v5547_v56 = vpop.eup %5546  ;;  %5020 = vmatprep.subr.bf16.mxu1 %v6460_v3  ;;  %4974 = vmatpush1.bf16.msra.mxu0 %v6443_v27  ;;  %v2528_v31 = vand.u32 4294901760, %v5545_v20  ;;  %v6473_v12 = vsub.f32 %v5541_v36, %v2530_v14  ;;  %v2641_v18 = vand.u32 4294901760, %v2640_v47  ;;  %v7079_v60 = vand.u32 4294901760, %v6462_v17 }
 0x25e   : > { %v5549_v43 = vpop.eup %5548  ;;  %5022 = vmatpush1.bf16.msra.mxu1 %v6448_v55  ;;  %v6477_v38 = vsub.f32 %v5543_v4, %v1838_v33  ;;  %v1844_v24 = vand.u32 4294901760, %v5547_v56  ;;  %v1962_v42 = vsub.f32 %v6455_v49, %v7081_v34  ;;  %v1956_v19 = vsub.f32 %v6427_v39, %v7078_v25 }
 0x25f   : > { %v5551_v44 = vpop.eup %5550  ;;  %v6485_v52 = vsub.f32 %v5545_v20, %v2528_v31  ;;  %v2534_v57 = vand.u32 4294901760, %v5549_v43  ;;  %v2652_v16 = vsub.f32 %v6462_v17, %v7079_v60  ;;  %v7084_v45 = vand.u32 4294901760, %v6445_v62 }
 0x260   : > { %v5553_v8 = vpop.eup %5552  ;;  %v1842_v26 = vand.u32 4294901760, %v5551_v44  ;;  %v6491_v21 = vpack.c.bf16 %v1844_v24, %v1840_v54  ;;  %v6493_v35 = vsub.f32 %v5547_v56, %v1844_v24  ;;  %v1963_v36 = vand.u32 4294901760, %v1962_v42 }
 0x261   : > { %v2532_v28 = vand.u32 4294901760, %v5553_v8  ;;  %v6495_v4 = vpack.c.bf16 %v2534_v57, %v2530_v14  ;;  %v6497_v47 = vsub.f32 %v5549_v43, %v2534_v57  ;;  %v2653_v20 = vand.u32 4294901760, %v2652_v16 }
 0x262   : > { %v6499_v46 = vpack.c.bf16 %v1842_v26, %v1838_v33  ;;  %v6501_v25 = vsub.f32 %v5551_v44, %v1842_v26  ;;  %v4979_v60 = vpack.c.bf16 %v1963_v36, %v1951_v53  ;;  %v1957_v63 = vand.u32 4294901760, %v1956_v19 }
 0x263   : > { %v6503_v34 = vpack.c.bf16 %v2532_v28, %v2528_v31  ;;  %v6505_v11 = vsub.f32 %v5553_v8, %v2532_v28  ;;  %v5027_v54 = vpack.c.bf16 %v2653_v20, %v2641_v18  ;;  %v1968_v56 = vsub.f32 %v6445_v62, %v7084_v45 }
 0x264   : > { %4976 = vmatprep.subr.bf16.mxu0 %v6499_v46  ;;  %v2646_v14 = vsub.f32 %v6431_v1, %v7083_v61  ;;  %v2657_v33 = vand.u32 4294901760, %v6450_v58  ;;  %v1973_v53 = vand.u32 4294901760, %v6477_v38  ;;  %v1985_v31 = vand.u32 4294901760, %v6501_v25 }
 0x265   : > { %5024 = vmatprep.subr.bf16.mxu1 %v6503_v34  ;;  %4978 = vmatpush1.bf16.msra.mxu0 %v6491_v21  ;;  %v1969_v18 = vand.u32 4294901760, %v1968_v56  ;;  %v2663_v43 = vand.u32 4294901760, %v6485_v52  ;;  %v2675_v24 = vand.u32 4294901760, %v6505_v11  ;;  %v1979_v42 = vand.u32 4294901760, %v6468_v30 }
 0x266   : > { %5026 = vmatpush1.bf16.msra.mxu1 %v6495_v4  ;;  %4980 = vmatprep.subr.bf16.mxu0 %v4979_v60  ;;  %v2647_v19 = vand.u32 4294901760, %v2646_v14  ;;  %v2658_v44 = vsub.f32 %v6450_v58, %v2657_v33  ;;  %v1974_v57 = vsub.f32 %v6477_v38, %v1973_v53  ;;  %v1986_v16 = vsub.f32 %v6501_v25, %v1985_v31 }
 0x267   : > { %5028 = vmatprep.subr.bf16.mxu1 %v5027_v54  ;;  %v4981_v8 = vpack.c.bf16 %v1969_v18, %v1957_v63  ;;  %v2664_v26 = vsub.f32 %v6485_v52, %v2663_v43  ;;  %v2676_v36 = vsub.f32 %v6505_v11, %v2675_v24  ;;  %v1980_v28 = vsub.f32 %v6468_v30, %v1979_v42 }
 0x268   : > { %1908 = vmatmul.mubr.f32.vlgmr.msra.gmra.mrb[8].mxu0 %v6425_v22  ;;  %v2659_v20 = vand.u32 4294901760, %v2658_v44  ;;  %v1975_v56 = vand.u32 4294901760, %v1974_v57  ;;  %v1987_v60 = vand.u32 4294901760, %v1986_v16  ;;  %v1991_v14 = vand.u32 4294901760, %v6493_v35 }
 0x269   : > { %2598 = vmatmul.mubr.f32.vlgmr.msra.gmra.mrb[8].mxu1 %v6425_v22  ;;  %4982 = vmatpush1.bf16.msra.mxu0 %v4981_v8  ;;  %v2665_v61 = vand.u32 4294901760, %v2664_v26  ;;  %v2677_v45 = vand.u32 4294901760, %v2676_v36  ;;  %v1981_v54 = vand.u32 4294901760, %v1980_v28  ;;  %v2669_v63 = vand.u32 4294901760, %v6473_v12 }
 0x26a   : > { %v5029_v18 = vpack.c.bf16 %v2659_v20, %v2647_v19  ;;  %1913 = vmatprep.mubr.f32.mxu0 %v5788_v7  ;;  %2603 = vmatprep.mubr.f32.mxu1 %v5788_v7  ;;  %v4983_v9 = vpack.c.bf16 %v1987_v60, %v1975_v56  ;;  %v1992_v44 = vsub.f32 %v6493_v35, %v1991_v14  ;;  %v2681_v57 = vand.u32 4294901760, %v6497_v47 }
 0x26b   : > { %v5031_v16 = vpack.c.bf16 %v2677_v45, %v2665_v61  ;;  %v2670_v0 = vsub.f32 %v6473_v12, %v2669_v63  ;;  %v4987_v22 = vpack.c.bf16 %v6455_v49, %v6435_v37  ;;  %v5035_v8 = vpack.c.bf16 %v6462_v17, %v6439_v29 }
 0x26c   : > { %5030 = vmatpush1.bf16.msra.mxu1 %v5029_v18  ;;  %1919 = vmatmul.mubr.f32.gmra.mrb[10].mxu0 %v6429_v40  ;;  %v1993_v19 = vand.u32 4294901760, %v1992_v44  ;;  %v2682_v26 = vsub.f32 %v6497_v47, %v2681_v57  ;;  %v4989_v36 = vpack.c.bf16 %v6445_v62, %v6427_v39  ;;  %v5037_v61 = vpack.c.bf16 %v6450_v58, %v6431_v1 }
 0x26d   : > { %4984 = vmatprep.subr.bf16.mxu0 %v4983_v9  ;;  %2609 = vmatmul.mubr.f32.gmra.mrb[10].mxu1 %v6429_v40  ;;  %v2671_v45 = vand.u32 4294901760, %v2670_v0  ;;  %v4991_v28 = vpack.c.bf16 %v6501_v25, %v6477_v38  ;;  %v5039_v20 = vpack.c.bf16 %v6505_v11, %v6485_v52  ;;  %v4993_v56 = vpack.c.bf16 %v6493_v35, %v6468_v30 }
 0x26e   : > { %5032 = vmatprep.subr.bf16.mxu1 %v5031_v16  ;;  %v4985_v60 = vpack.c.bf16 %v1993_v19, %v1981_v54  ;;  %v2683_v18 = vand.u32 4294901760, %v2682_v26  ;;  %1924 = vmatprep.mubr.f32.mxu0 %v5788_v7  ;;  %v5041_v9 = vpack.c.bf16 %v6497_v47, %v6473_v12  ;;  %v7117_v40 = vand.u32 4294901760, %v6435_v37 }
 0x26f   : > { %v7118_v0 = vand.u32 4294901760, %v6455_v49  ;;  %2614 = vmatprep.mubr.f32.mxu1 %v5788_v7  ;;  %v7119_v25 = vand.u32 4294901760, %v6439_v29  ;;  %v7120_v11 = vand.u32 4294901760, %v6462_v17  ;;  %v7121_v38 = vand.u32 4294901760, %v6427_v39 }
 0x270   : > { %v7122_v52 = vand.u32 4294901760, %v6445_v62  ;;  %v7123_v12 = vand.u32 4294901760, %v6431_v1  ;;  %v6577_v37 = vpack.c.bf16 %v1985_v31, %v1973_v53  ;;  %4986 = vmatpush1.bf16.msra.mxu0 %v4985_v60  ;;  %v5033_v49 = vpack.c.bf16 %v2683_v18, %v2671_v45 }
 0x271   : > { %v5003_v58 = vpack.c.bf16 %v7118_v0, %v7117_v40  ;;  %v5051_v30 = vpack.c.bf16 %v7120_v11, %v7119_v25  ;;  %v6579_v54 = vpack.c.bf16 %v2675_v24, %v2663_v43  ;;  %v6581_v29 = vpack.c.bf16 %v1991_v14, %v1979_v42  ;;  %4988 = vmatprep.subr.bf16.mxu0 %v4987_v22  ;;  %v5620_v14 = vld [vmem:[#allocation7 + $0x10] sm:$0xff] }
 0x272   : > { %v6571_v35 = vpack.c.bf16 %v7122_v52, %v7121_v38  ;;  %v6575_v47 = vpack.c.bf16 %v2657_v33, %v7123_v12  ;;  %v6583_v17 = vpack.c.bf16 %v2681_v57, %v2669_v63  ;;  %1930 = vmatmul.mubr.f32.gmra.mrb[12].mxu0 %v6437_v48  ;;  %v7124_v39 = vsub.f32 %v6411_v59, %v6421_v32  ;;  %v5621_v63 = vld [vmem:[#allocation7 + $0x18] sm:$0xff] }
 0x273   : > { %5034 = vmatpush1.bf16.msra.mxu1 %v5033_v49  ;;  %1935 = vmatprep.mubr.f32.mxu0 %v5788_v7  ;;  %v5790_v45 = vmov 4  }
 0x274   : > { %v1940_v62 = vand.u32 4294901760, %v7124_v39  ;;  %5036 = vmatprep.subr.bf16.mxu1 %v5035_v8  ;;  %2620 = vmatmul.mubr.f32.gmra.mrb[12].mxu1 %v6437_v48  ;;  %v222_v8 = vld [vmem:[#allocation7] sm:$0x1] }
 0x275   : > { %2625 = vmatprep.mubr.f32.mxu1 %v5788_v7 }
 0x276   : > { %1941 = vmatmul.mubr.f32.gmra.mrb[14].mxu0 %v1940_v62 }
 0x277   : > { %2051 = vmatprep.mubr.f32.mxu0 %v5788_v7 }
 0x278   : > { %2631 = vmatmul.mubr.f32.gmra.mrb[14].mxu1 %v1940_v62 }
 0x279   : > { %2741 = vmatprep.mubr.f32.mxu1 %v5788_v7 }
 0x27a   : > { %2053 = vmatmul.mubr.f32.vlgmr.msra.gmra.mrb[8].mxu0 %v6385_v41 }
 0x27b   : > { %4990 = vmatpush1.bf16.msra.mxu0 %v4989_v36  ;;  %2058 = vmatprep.mubr.f32.mxu0 %v5788_v7 }
 0x27c   : > { %2743 = vmatmul.mubr.f32.vlgmr.msra.gmra.mrb[8].mxu1 %v6385_v41  ;;  %4992 = vmatprep.subr.bf16.mxu0 %v4991_v28 }
 0x27d   : > { %5038 = vmatpush1.bf16.msra.mxu1 %v5037_v61  ;;  %2748 = vmatprep.mubr.f32.mxu1 %v5788_v7 }
 0x27e   : > { %5040 = vmatprep.subr.bf16.mxu1 %v5039_v20  ;;  %2060 = vmatmul.mubr.f32.gmra.mrb[10].mxu0 %v6388_v51 }
 0x27f   : > { %4994 = vmatpush1.bf16.msra.mxu0 %v4993_v56  ;;  %2065 = vmatprep.mubr.f32.mxu0 %v5788_v7 }
 0x280   : > { %2750 = vmatmul.mubr.f32.gmra.mrb[10].mxu1 %v6388_v51  ;;  %4996 = vmatprep.subr.bf16.mxu0 %v6453_v10 }
 0x281   : > { %5042 = vmatpush1.bf16.msra.mxu1 %v5041_v9  ;;  %2755 = vmatprep.mubr.f32.mxu1 %v5788_v7 }
 0x282   : > { %5044 = vmatprep.subr.bf16.mxu1 %v6460_v3  ;;  %2067 = vmatmul.mubr.f32.gmra.mrb[12].mxu0 %v6390_v2 }
 0x283   : > { %2072 = vmatprep.mubr.f32.mxu0 %v5788_v7 }
 0x284   : > { %2757 = vmatmul.mubr.f32.gmra.mrb[12].mxu1 %v6390_v2 }
 0x285   : > { %2762 = vmatprep.mubr.f32.mxu1 %v5788_v7 }
 0x286   : > { %2074 = vmatmul.mubr.f32.gmra.mrb[14].mxu0 %v6399_v23 }
 0x287   : > { %2160 = vmatprep.mubr.f32.mxu0 %v5788_v7 }
 0x288   : > { %2764 = vmatmul.mubr.f32.gmra.mrb[14].mxu1 %v6399_v23 }
 0x289   : > { %2850 = vmatprep.mubr.f32.mxu1 %v5788_v7 }
 0x28a   : > { %2163 = vmatmul.mubr.f32.vlgmr.msra.gmra.mrb[8].mxu0 %v6394_v5 }
 0x28b   : > { %4998 = vmatpush1.bf16.msra.mxu0 %v6443_v27  ;;  %2168 = vmatprep.mubr.f32.mxu0 %v5788_v7 }
 0x28c   : > { %2853 = vmatmul.mubr.f32.vlgmr.msra.gmra.mrb[8].mxu1 %v6394_v5  ;;  %5000 = vmatprep.subr.bf16.mxu0 %v6499_v46  ;;  %v7125_v5 = vld [vmem:[#allocation13_spill] sm:$0xff] }
 0x28d   : > { %5046 = vmatpush1.bf16.msra.mxu1 %v6448_v55  ;;  %2858 = vmatprep.mubr.f32.mxu1 %v5788_v7 }
 0x28e   : > { %5048 = vmatprep.subr.bf16.mxu1 %v6503_v34  ;;  %2171 = vmatmul.mubr.f32.gmra.mrb[10].mxu0 %v6397_v15 }
 0x28f   : > { %5002 = vmatpush1.bf16.msra.mxu0 %v6491_v21  ;;  %2176 = vmatprep.mubr.f32.mxu0 %v5788_v7 }
 0x290   : > { %2861 = vmatmul.mubr.f32.gmra.mrb[10].mxu1 %v6397_v15  ;;  %5004 = vmatprep.subr.bf16.mxu0 %v5003_v58  ;;  %v3229_v15 = vld [vmem:[#allocation5 + $0x50] sm:$0xff] }
 0x291   : > { %5050 = vmatpush1.bf16.msra.mxu1 %v6495_v4  ;;  %2866 = vmatprep.mubr.f32.mxu1 %v5788_v7 }
 0x292   : > { %5052 = vmatprep.subr.bf16.mxu1 %v5051_v30  ;;  %2179 = vmatmul.mubr.f32.gmra.mrb[12].mxu0 %v6402_v50 }
 0x293   : > { %2184 = vmatprep.mubr.f32.mxu0 %v5788_v7 }
 0x294   : > { %2869 = vmatmul.mubr.f32.gmra.mrb[12].mxu1 %v6402_v50 }
 0x295   : > { %2874 = vmatprep.mubr.f32.mxu1 %v5788_v7 }
 0x296   : > { %2187 = vmatmul.mubr.f32.gmra.mrb[14].mxu0 %v6411_v59 }
 0x297   : > { %2265 = vmatprep.mubr.f32.mxu0 %v5788_v7 }
 0x298   : > { %2877 = vmatmul.mubr.f32.gmra.mrb[14].mxu1 %v6411_v59 }
 0x299   : > { %2955 = vmatprep.mubr.f32.mxu1 %v5788_v7 }
 0x29a   : > { %2269 = vmatmul.mubr.f32.vlgmr.msra.gmra.mrb[8].mxu0 %v6405_v6 }
 0x29b   : > { %5006 = vmatpush1.bf16.msra.mxu0 %v6571_v35  ;;  %2274 = vmatprep.mubr.f32.mxu0 %v5788_v7 }
 0x29c   : > { %2959 = vmatmul.mubr.f32.vlgmr.msra.gmra.mrb[8].mxu1 %v6405_v6  ;;  %5008 = vmatprep.subr.bf16.mxu0 %v6577_v37  ;;  %v3230_v6 = vld [vmem:[#allocation5 + $0x58] sm:$0xff] }
 0x29d   : > { %5054 = vmatpush1.bf16.msra.mxu1 %v6575_v47  ;;  %2964 = vmatprep.mubr.f32.mxu1 %v5788_v7 }
 0x29e   : > { %5056 = vmatprep.subr.bf16.mxu1 %v6579_v54  ;;  %2278 = vmatmul.mubr.f32.gmra.mrb[10].mxu0 %v6408_v13 }
 0x29f   : > { %5010 = vmatpush1.bf16.msra.mxu0 %v6581_v29  ;;  %2283 = vmatprep.mubr.f32.mxu0 %v5788_v7 }
 0x2a0   : > { %2968 = vmatmul.mubr.f32.gmra.mrb[10].mxu1 %v6408_v13  ;;  %5012 = vmatprep.subr.bf16.mxu0 %v6453_v10 }
 0x2a1   : > { %5058 = vmatpush1.bf16.msra.mxu1 %v6583_v17  ;;  %2973 = vmatprep.mubr.f32.mxu1 %v5788_v7 }
 0x2a2   : > { %5060 = vmatprep.subr.bf16.mxu1 %v6460_v3  ;;  %2287 = vmatmul.mubr.f32.gmra.mrb[12].mxu0 %v7125_v5  ;;  %v5618_v3 = vld [vmem:[#allocation7] sm:$0xff] }
 0x2a3   : > { %2292 = vmatprep.mubr.f32.mxu0 %v5788_v7 }
 0x2a4   : > { %2977 = vmatmul.mubr.f32.gmra.mrb[12].mxu1 %v7125_v5 }
 0x2a5   : > { %2982 = vmatprep.mubr.f32.mxu1 %v5788_v7 }
 0x2a6   : > { %2296 = vmatmul.mubr.f32.gmra.mrb[14].mxu0 %v6421_v32 }
 0x2a7   : > { %2390 = vmatprep.mubr.f32.mxu0 %v5788_v7 }
 0x2a8   : > { %2986 = vmatmul.mubr.f32.gmra.mrb[14].mxu1 %v6421_v32  ;;  %v3241_v32 = vsel %vm404_vm0, %v3230_v6, 0 }
 0x2a9   : > { %3080 = vmatprep.mubr.f32.mxu1 %v5788_v7  ;;  %v6706_v48 = vand.u32 4294901760, %v3241_v32 }
 0x2aa   : > { %2392 = vmatmul.mubr.f32.vlgmr.msra.gmra.mrb[8].mxu0 %v6385_v41 }
 0x2ab   : > { %5014 = vmatpush1.bf16.msra.mxu0 %v6443_v27  ;;  %2397 = vmatprep.mubr.f32.mxu0 %v5788_v7  ;;  %v5789_v27 = vmov 3   ;;  %v6718_v43 = vsub.f32 %v3241_v32, %v6706_v48 }
 0x2ac   : > { %3082 = vmatmul.mubr.f32.vlgmr.msra.gmra.mrb[8].mxu1 %v6385_v41  ;;  %5016 = vmatprep.subr.bf16.mxu0 %v6499_v46 }
 0x2ad   : > { %5062 = vmatpush1.bf16.msra.mxu1 %v6448_v55  ;;  %3087 = vmatprep.mubr.f32.mxu1 %v5788_v7  ;;  %v6730_v26 = vand.u32 4294901760, %v6718_v43 }
 0x2ae   : > { %5064 = vmatprep.subr.bf16.mxu1 %v6503_v34  ;;  %2399 = vmatmul.mubr.f32.gmra.mrb[10].mxu0 %v6388_v51  ;;  %v5619_v34 = vld [vmem:[#allocation7 + $0x8] sm:$0xff] }
 0x2af   : > { %5018 = vmatpush1.bf16.msra.mxu0 %v6491_v21  ;;  %2404 = vmatprep.mubr.f32.mxu0 %v5788_v7  ;;  %7126 = vst [vmem:[#allocation13_spill] sm:$0xff] %v6730_v26  ;;  %v3352_v58 = vsub.f32 %v6718_v43, %v6730_v26 }
 0x2b0   : > { %3089 = vmatmul.mubr.f32.gmra.mrb[10].mxu1 %v6388_v51  ;;  %5486 = vset.pattern.permute.xlu0 %v5789_v27 }
 0x2b1   : > { %5066 = vmatpush1.bf16.msra.mxu1 %v6495_v4  ;;  %3094 = vmatprep.mubr.f32.mxu1 %v5788_v7 }
 0x2b2   : > { %2406 = vmatmul.mubr.f32.gmra.mrb[12].mxu0 %v6390_v2  ;;  %5487 = vset.pattern.permute.xlu1 %v5789_v27 }
 0x2b3   : > { %2411 = vmatprep.mubr.f32.mxu0 %v5788_v7  ;;  %4640 = vperm.xlu0 %5486, %v5618_v3  }
 0x2b4   : > { %3096 = vmatmul.mubr.f32.gmra.mrb[12].mxu1 %v6390_v2  ;;  %4644 = vperm.xlu1 %5487, %v5619_v34  }
 0x2b5   : > { %3101 = vmatprep.mubr.f32.mxu1 %v5788_v7 }
 0x2b6   : > { %2413 = vmatmul.mubr.f32.gmra.mrb[14].mxu0 %v6399_v23 }
 0x2b7   : > { %2491 = vmatprep.mubr.f32.mxu0 %v5788_v7  ;;  %4652 = vperm.xlu0 %5486, %v5621_v63  }
 0x2b8   : > { %3103 = vmatmul.mubr.f32.gmra.mrb[14].mxu1 %v6399_v23  ;;  %4648 = vperm.xlu1 %5487, %v5620_v14  }
 0x2b9   : > { %3181 = vmatprep.mubr.f32.mxu1 %v5788_v7 }
 0x2ba   : > { %2493 = vmatmul.mubr.f32.vlgmr.msra.gmra.mrb[8].mxu0 %v6385_v41 }
 0x2bb   : > { %2498 = vmatprep.mubr.f32.mxu0 %v5788_v7  ;;  %5489 = vset.pattern.permute.xlu0 %v5790_v45 }
 0x2bc   : > { %3183 = vmatmul.mubr.f32.vlgmr.msra.gmra.mrb[8].mxu1 %v6385_v41  ;;  %v3227_v41 = vld [vmem:[#allocation5 + $0x40] sm:$0xff]  ;;  %5488 = vset.pattern.permute.xlu1 %v5790_v45 }
 0x2bd   : > { %3188 = vmatprep.mubr.f32.mxu1 %v5788_v7  ;;  %v3232_v50 = vsel %vm404_vm0, %v3227_v41, 0  ;;  %4709 = vperm.xlu1 %5488, %v222_v8  }
 0x2be   : > { %2500 = vmatmul.mubr.f32.gmra.mrb[10].mxu0 %v6388_v51  ;;  %v6699_v59 = vand.u32 4294901760, %v3232_v50 }
 0x2bf   : > { %2505 = vmatprep.mubr.f32.mxu0 %v5788_v7 }
 0x2c0   : > { %3190 = vmatmul.mubr.f32.gmra.mrb[10].mxu1 %v6388_v51  ;;  %v3228_v51 = vld [vmem:[#allocation5 + $0x48] sm:$0xff]  ;;  %v6709_v10 = vsub.f32 %v3232_v50, %v6699_v59 }
 0x2c1   : > { %3195 = vmatprep.mubr.f32.mxu1 %v5788_v7  ;;  %v3235_v13 = vsel %vm404_vm0, %v3228_v51, 0  ;;  %v6751_v51 = vand.u32 4294901760, %v3352_v58 }
 0x2c2   : > { %2507 = vmatmul.mubr.f32.gmra.mrb[12].mxu0 %v6390_v2  ;;  %v6702_v1 = vand.u32 4294901760, %v3235_v13  ;;  %v6721_v42 = vand.u32 4294901760, %v6709_v10 }
 0x2c3   : > { %2512 = vmatprep.mubr.f32.mxu0 %v5788_v7 }
 0x2c4   : > { %3197 = vmatmul.mubr.f32.gmra.mrb[12].mxu1 %v6390_v2  ;;  %v3238_v2 = vsel %vm404_vm0, %v3229_v15, 0  ;;  %v6712_v4 = vsub.f32 %v3235_v13, %v6702_v1  ;;  %v3319_v61 = vsub.f32 %v6709_v10, %v6721_v42 }
 0x2c5   : > { %3202 = vmatprep.mubr.f32.mxu1 %v5788_v7  ;;  %v6704_v46 = vand.u32 4294901760, %v3238_v2 }
 0x2c6   : > { %2514 = vmatmul.mubr.f32.gmra.mrb[14].mxu0 %v6399_v23  ;;  %v6724_v57 = vand.u32 4294901760, %v6712_v4  ;;  %v6740_v38 = vand.u32 4294901760, %v3319_v61 }
 0x2c7   : > { %3315 = vmatprep.mubr.f32.mxu0 %v5788_v7  ;;  %v6715_v53 = vsub.f32 %v3238_v2, %v6704_v46 }
 0x2c8   : > { %3204 = vmatmul.mubr.f32.gmra.mrb[14].mxu1 %v6399_v23  ;;  %v3330_v20 = vsub.f32 %v6712_v4, %v6724_v57 }
 0x2c9   : > { %4005 = vmatprep.mubr.f32.mxu1 %v5788_v7  ;;  %v6727_v22 = vand.u32 4294901760, %v6715_v53 }
 0x2ca   : > { %v6744_v37 = vand.u32 4294901760, %v3330_v20 }
 0x2cb   : > { %v3341_v18 = vsub.f32 %v6715_v53, %v6727_v22 }
 0x2cd   : > { %v6748_v39 = vand.u32 4294901760, %v3341_v18 }
 0x38d   : > { %v2494_v23 = vpop.f32.mrb[8].mxu0 }
 0x38e   : > { %5554 = vtanh.f32 %v2494_v23  ;;  %v2496_v55 = vpop.f32.mrb[9].mxu0 }
 0x38f   : > { %v3184_v21 = vpop.f32.mrb[8].mxu1  ;;  %5556 = vtanh.f32 %v2496_v55 }
 0x390   : > { %5558 = vtanh.f32 %v3184_v21  ;;  %v3186_v33 = vpop.f32.mrb[9].mxu1 }
 0x391   : > { %5560 = vtanh.f32 %v3186_v33  ;;  %v2501_v31 = vpop.f32.mrb[10].mxu0 }
 0x392   : > { %5562 = vtanh.f32 %v2501_v31  ;;  %v2503_v24 = vpop.f32.mrb[11].mxu0 }
 0x393   : > { %v3191_v44 = vpop.f32.mrb[10].mxu1  ;;  %5564 = vtanh.f32 %v2503_v24 }
 0x394   : > { %5566 = vtanh.f32 %v3191_v44  ;;  %v3193_v16 = vpop.f32.mrb[11].mxu1 }
 0x395   : > { %5568 = vtanh.f32 %v3193_v16  ;;  %v2508_v19 = vpop.f32.mrb[12].mxu0 }
 0x396   : > { %5570 = vtanh.f32 %v2508_v19  ;;  %v2510_v36 = vpop.f32.mrb[13].mxu0 }
 0x397   : > { %v3198_v28 = vpop.f32.mrb[12].mxu1  ;;  %5572 = vtanh.f32 %v2510_v36 }
 0x398   : > { %v5555_v56 = vpop.eup %5554  ;;  %5574 = vtanh.f32 %v3198_v28  ;;  %v3200_v60 = vpop.f32.mrb[13].mxu1 }
 0x399   : > { %v5557_v9 = vpop.eup %5556  ;;  %5576 = vtanh.f32 %v3200_v60  ;;  %v2515_v40 = vpop.f32.mrb[14].mxu0  ;;  %v3245_v0 = vand.u32 4294901760, %v5555_v56 }
 0x39a   : > { %v5559_v25 = vpop.eup %5558  ;;  %5578 = vtanh.f32 %v2515_v40  ;;  %v2517_v11 = vpop.f32.mrb[15].mxu0  ;;  %v3243_v30 = vand.u32 4294901760, %v5557_v9 }
 0x39b   : > { %v5561_v52 = vpop.eup %5560  ;;  %v3205_v35 = vpop.f32.mrb[14].mxu1  ;;  %5580 = vtanh.f32 %v2517_v11  ;;  %v6742_v12 = vsub.f32 %v5555_v56, %v3245_v0  ;;  %v3935_v47 = vand.u32 4294901760, %v5559_v25 }
 0x39c   : > { %v5563_v49 = vpop.eup %5562  ;;  %5582 = vtanh.f32 %v3205_v35  ;;  %v3207_v54 = vpop.f32.mrb[15].mxu1  ;;  %v6746_v29 = vsub.f32 %v5557_v9, %v3243_v30  ;;  %v3933_v17 = vand.u32 4294901760, %v5561_v52 }
 0x39d   : > { %v5565_v62 = vpop.eup %5564  ;;  %5584 = vtanh.f32 %v3207_v54  ;;  %v3249_v5 = vand.u32 4294901760, %v5563_v49  ;;  %v7088_v41 = vand.u32 4294901760, %v6742_v12  ;;  %v6755_v13 = vsub.f32 %v5559_v25, %v3935_v47 }
 0x39e   : > { %v5567_v15 = vpop.eup %5566  ;;  %v3247_v50 = vand.u32 4294901760, %v5565_v62  ;;  %v6753_v6 = vsub.f32 %v5561_v52, %v3933_v17  ;;  %v7094_v2 = vand.u32 4294901760, %v6746_v29 }
 0x39f   : > { %v5569_v32 = vpop.eup %5568  ;;  %v6758_v23 = vpack.c.bf16 %v3249_v5, %v3245_v0  ;;  %v6760_v27 = vsub.f32 %v5563_v49, %v3249_v5  ;;  %v3939_v55 = vand.u32 4294901760, %v5567_v15  ;;  %v6765_v3 = vsub.f32 %v6742_v12, %v7088_v41 }
 0x3a0   : > { %v5571_v34 = vpop.eup %5570  ;;  %v6767_v21 = vpack.c.bf16 %v3247_v50, %v3243_v30  ;;  %v6769_v33 = vsub.f32 %v5565_v62, %v3247_v50  ;;  %v3937_v31 = vand.u32 4294901760, %v5569_v32  ;;  %v3363_v24 = vsub.f32 %v6746_v29, %v7094_v2 }
 0x3a1   : > { %v5573_v14 = vpop.eup %5572  ;;  %v6774_v63 = vpack.c.bf16 %v3939_v55, %v3935_v47  ;;  %v6776_v44 = vsub.f32 %v5567_v15, %v3939_v55  ;;  %v3253_v16 = vand.u32 4294901760, %v5571_v34  ;;  %v7092_v8 = vand.u32 4294901760, %v6753_v6 }
 0x3a2   : > { %v5575_v19 = vpop.eup %5574  ;;  %5068 = vmatprep.subr.bf16.mxu0 %v6767_v21  ;;  %v6780_v36 = vpack.c.bf16 %v3937_v31, %v3933_v17  ;;  %v6782_v61 = vsub.f32 %v5569_v32, %v3937_v31  ;;  %v3251_v45 = vand.u32 4294901760, %v5573_v14  ;;  %v3364_v28 = vand.u32 4294901760, %v3363_v24 }
 0x3a3   : > { %v5577_v20 = vpop.eup %5576  ;;  %5070 = vmatpush1.bf16.msra.mxu0 %v6758_v23  ;;  %v6785_v56 = vsub.f32 %v5571_v34, %v3253_v16  ;;  %v3943_v60 = vand.u32 4294901760, %v5575_v19  ;;  %v7093_v18 = vand.u32 4294901760, %v6769_v33  ;;  %v4053_v9 = vsub.f32 %v6753_v6, %v7092_v8 }
 0x3a4   : > { %v5579_v40 = vpop.eup %5578  ;;  %5116 = vmatprep.subr.bf16.mxu1 %v6780_v36  ;;  %v6792_v0 = vsub.f32 %v5573_v14, %v3251_v45  ;;  %v3941_v58 = vand.u32 4294901760, %v5577_v20  ;;  %v7091_v25 = vand.u32 4294901760, %v6782_v61  ;;  %v3370_v11 = vand.u32 4294901760, %v6765_v3 }
 0x3a5   : > { %v5581_v30 = vpop.eup %5580  ;;  %5118 = vmatpush1.bf16.msra.mxu1 %v6774_v63  ;;  %v3257_v52 = vand.u32 4294901760, %v5579_v40  ;;  %v6797_v35 = vsub.f32 %v5575_v19, %v3943_v60  ;;  %v3375_v47 = vsub.f32 %v6769_v33, %v7093_v18  ;;  %v4054_v49 = vand.u32 4294901760, %v4053_v9 }
 0x3a6   : > { %v5583_v54 = vpop.eup %5582  ;;  %v3255_v17 = vand.u32 4294901760, %v5581_v30  ;;  %v6802_v62 = vsub.f32 %v5577_v20, %v3941_v58  ;;  %v4065_v5 = vsub.f32 %v6782_v61, %v7091_v25  ;;  %v7090_v15 = vand.u32 4294901760, %v6760_v27 }
 0x3a7   : > { %v5585_v50 = vpop.eup %5584  ;;  %v6808_v32 = vpack.c.bf16 %v3257_v52, %v3253_v16  ;;  %v6810_v55 = vsub.f32 %v5579_v40, %v3257_v52  ;;  %v3947_v3 = vand.u32 4294901760, %v5583_v54  ;;  %v3376_v34 = vand.u32 4294901760, %v3375_v47 }
 0x3a8   : > { %v6812_v31 = vpack.c.bf16 %v3255_v17, %v3251_v45  ;;  %v6814_v24 = vsub.f32 %v5581_v30, %v3255_v17  ;;  %v3945_v14 = vand.u32 4294901760, %v5585_v50  ;;  %v4066_v19 = vand.u32 4294901760, %v4065_v5 }
 0x3a9   : > { %v6816_v20 = vpack.c.bf16 %v3947_v3, %v3943_v60  ;;  %v6818_v9 = vsub.f32 %v5583_v54, %v3947_v3  ;;  %v5075_v41 = vpack.c.bf16 %v3376_v34, %v3364_v28  ;;  %v3381_v16 = vsub.f32 %v6760_v27, %v7090_v15 }
 0x3aa   : > { %5072 = vmatprep.subr.bf16.mxu0 %v6812_v31  ;;  %v6824_v40 = vpack.c.bf16 %v3945_v14, %v3941_v58  ;;  %v6826_v52 = vsub.f32 %v5585_v50, %v3945_v14  ;;  %v5123_v45 = vpack.c.bf16 %v4066_v19, %v4054_v49  ;;  %v7089_v30 = vand.u32 4294901760, %v6755_v13 }
 0x3ab   : > { %5074 = vmatpush1.bf16.msra.mxu0 %v6808_v32  ;;  %v3382_v60 = vand.u32 4294901760, %v3381_v16  ;;  %v4070_v47 = vand.u32 4294901760, %v6776_v44  ;;  %v3386_v28 = vand.u32 4294901760, %v6792_v0  ;;  %v3398_v54 = vand.u32 4294901760, %v6814_v24 }
 0x3ac   : > { %5120 = vmatprep.subr.bf16.mxu1 %v6824_v40  ;;  %5076 = vmatprep.subr.bf16.mxu0 %v5075_v41  ;;  %v4059_v58 = vsub.f32 %v6755_v13, %v7089_v30  ;;  %v4076_v49 = vand.u32 4294901760, %v6802_v62  ;;  %v4088_v17 = vand.u32 4294901760, %v6826_v52  ;;  %v3392_v5 = vand.u32 4294901760, %v6785_v56 }
 0x3ad   : > { %5122 = vmatpush1.bf16.msra.mxu1 %v6816_v20  ;;  %v5077_v50 = vpack.c.bf16 %v3382_v60, %v3370_v11  ;;  %v4071_v3 = vsub.f32 %v6776_v44, %v4070_v47  ;;  %v3387_v34 = vsub.f32 %v6792_v0, %v3386_v28  ;;  %v3399_v14 = vsub.f32 %v6814_v24, %v3398_v54 }
 0x3ae   : > { %5124 = vmatprep.subr.bf16.mxu1 %v5123_v45  ;;  %3321 = vmatmul.mubr.f32.vlgmr.msra.gmra.mrb[16].mxu0 %v6740_v38  ;;  %v4060_v41 = vand.u32 4294901760, %v4059_v58  ;;  %v4077_v19 = vsub.f32 %v6802_v62, %v4076_v49  ;;  %v4089_v16 = vsub.f32 %v6826_v52, %v4088_v17  ;;  %v3393_v30 = vsub.f32 %v6785_v56, %v3392_v5 }
 0x3af   : > { %5078 = vmatpush1.bf16.msra.mxu0 %v5077_v50  ;;  %v4072_v15 = vand.u32 4294901760, %v4071_v3  ;;  %3326 = vmatprep.mubr.f32.mxu0 %v5788_v7  ;;  %v3388_v11 = vand.u32 4294901760, %v3387_v34  ;;  %v3400_v60 = vand.u32 4294901760, %v3399_v14  ;;  %v3404_v25 = vand.u32 4294901760, %v6810_v55 }
 0x3b0   : > { %4011 = vmatmul.mubr.f32.vlgmr.msra.gmra.mrb[16].mxu1 %v6740_v38  ;;  %v4078_v45 = vand.u32 4294901760, %v4077_v19  ;;  %v4090_v8 = vand.u32 4294901760, %v4089_v16  ;;  %v3394_v18 = vand.u32 4294901760, %v3393_v30  ;;  %v4082_v58 = vand.u32 4294901760, %v6797_v35 }
 0x3b1   : > { %v5125_v2 = vpack.c.bf16 %v4072_v15, %v4060_v41  ;;  %4016 = vmatprep.mubr.f32.mxu1 %v5788_v7  ;;  %v5079_v26 = vpack.c.bf16 %v3400_v60, %v3388_v11  ;;  %v3405_v50 = vsub.f32 %v6810_v55, %v3404_v25  ;;  %v4094_v3 = vand.u32 4294901760, %v6818_v9 }
 0x3b2   : > { %3332 = vmatmul.mubr.f32.gmra.mrb[18].mxu0 %v6744_v37  ;;  %v5127_v34 = vpack.c.bf16 %v4090_v8, %v4078_v45  ;;  %v4083_v14 = vsub.f32 %v6797_v35, %v4082_v58  ;;  %v5083_v38 = vpack.c.bf16 %v6769_v33, %v6746_v29  ;;  %v5131_v30 = vpack.c.bf16 %v6782_v61, %v6753_v6 }
 0x3b3   : > { %5126 = vmatpush1.bf16.msra.mxu1 %v5125_v2  ;;  %5080 = vmatprep.subr.bf16.mxu0 %v5079_v26  ;;  %v3406_v15 = vand.u32 4294901760, %v3405_v50  ;;  %v4095_v41 = vsub.f32 %v6818_v9, %v4094_v3  ;;  %v5085_v19 = vpack.c.bf16 %v6760_v27, %v6742_v12  ;;  %v5133_v16 = vpack.c.bf16 %v6776_v44, %v6755_v13 }
 0x3b4   : > { %4022 = vmatmul.mubr.f32.gmra.mrb[18].mxu1 %v6744_v37  ;;  %5128 = vmatprep.subr.bf16.mxu1 %v5127_v34  ;;  %v4084_v8 = vand.u32 4294901760, %v4083_v14  ;;  %v5087_v11 = vpack.c.bf16 %v6814_v24, %v6792_v0  ;;  %v5135_v2 = vpack.c.bf16 %v6826_v52, %v6802_v62  ;;  %v5089_v26 = vpack.c.bf16 %v6810_v55, %v6785_v56 }
 0x3b5   : > { %v5081_v60 = vpack.c.bf16 %v3406_v15, %v3394_v18  ;;  %v4096_v45 = vand.u32 4294901760, %v4095_v41  ;;  %3337 = vmatprep.mubr.f32.mxu0 %v5788_v7  ;;  %4027 = vmatprep.mubr.f32.mxu1 %v5788_v7  ;;  %v5137_v37 = vpack.c.bf16 %v6818_v9, %v6797_v35  ;;  %v7127_v44 = vand.u32 4294901760, %v6746_v29 }
 0x3b6   : > { %v7128_v50 = vand.u32 4294901760, %v6769_v33  ;;  %3343 = vmatmul.mubr.f32.gmra.mrb[20].mxu0 %v6748_v39  ;;  %v7129_v62 = vand.u32 4294901760, %v6753_v6  ;;  %v7130_v56 = vand.u32 4294901760, %v6782_v61  ;;  %v7131_v55 = vand.u32 4294901760, %v6742_v12 }
 0x3b7   : > { %v7132_v24 = vand.u32 4294901760, %v6760_v27  ;;  %v7133_v35 = vand.u32 4294901760, %v6755_v13  ;;  %v6896_v29 = vpack.c.bf16 %v3398_v54, %v3386_v28  ;;  %5082 = vmatpush1.bf16.msra.mxu0 %v5081_v60  ;;  %v5129_v33 = vpack.c.bf16 %v4096_v45, %v4084_v8  ;;  %3348 = vmatprep.mubr.f32.mxu0 %v5788_v7  ;;  %v4645_v13 = vpop.permute.xlu1 %4644 }
 0x3b8   : > { %v5099_v0 = vpack.c.bf16 %v7128_v50, %v7127_v44  ;;  %v5147_v18 = vpack.c.bf16 %v7130_v56, %v7129_v62  ;;  %v6899_v6 = vpack.c.bf16 %v4088_v17, %v4076_v49  ;;  %v6901_v61 = vpack.c.bf16 %v3404_v25, %v3392_v5  ;;  %5084 = vmatprep.subr.bf16.mxu0 %v5083_v38 }
 0x3b9   : > { %v6890_v52 = vpack.c.bf16 %v7132_v24, %v7131_v55  ;;  %v6894_v9 = vpack.c.bf16 %v4070_v47, %v7133_v35  ;;  %4033 = vmatmul.mubr.f32.gmra.mrb[20].mxu1 %v6748_v39  ;;  %v6904_v12 = vpack.c.bf16 %v4094_v3, %v4082_v58 }
 0x3ba   : > { %5130 = vmatpush1.bf16.msra.mxu1 %v5129_v33  ;;  %4038 = vmatprep.mubr.f32.mxu1 %v5788_v7 }
 0x3bb   : > { %5132 = vmatprep.subr.bf16.mxu1 %v5131_v30  ;;  %3354 = vmatmul.mubr.f32.gmra.mrb[22].mxu0 %v6751_v51  ;;  %v4649_v5 = vpop.permute.xlu1 %4648 }
 0x3bc   : > { %3464 = vmatprep.mubr.f32.mxu0 %v5788_v7 }
 0x3bd   : > { %4044 = vmatmul.mubr.f32.gmra.mrb[22].mxu1 %v6751_v51 }
 0x3be   : > { %4154 = vmatprep.mubr.f32.mxu1 %v5788_v7 }
 0x3bf   : > { %3466 = vmatmul.mubr.f32.vlgmr.msra.gmra.mrb[16].mxu0 %v6699_v59 }
 0x3c0   : > { %5086 = vmatpush1.bf16.msra.mxu0 %v5085_v19  ;;  %3471 = vmatprep.mubr.f32.mxu0 %v5788_v7 }
 0x3c1   : > { %4156 = vmatmul.mubr.f32.vlgmr.msra.gmra.mrb[16].mxu1 %v6699_v59  ;;  %5088 = vmatprep.subr.bf16.mxu0 %v5087_v11 }
 0x3c2   : > { %5134 = vmatpush1.bf16.msra.mxu1 %v5133_v16  ;;  %4161 = vmatprep.mubr.f32.mxu1 %v5788_v7 }
 0x3c3   : > { %5136 = vmatprep.subr.bf16.mxu1 %v5135_v2  ;;  %3473 = vmatmul.mubr.f32.gmra.mrb[18].mxu0 %v6702_v1 }
 0x3c4   : > { %5090 = vmatpush1.bf16.msra.mxu0 %v5089_v26  ;;  %3478 = vmatprep.mubr.f32.mxu0 %v5788_v7 }
 0x3c5   : > { %4163 = vmatmul.mubr.f32.gmra.mrb[18].mxu1 %v6702_v1  ;;  %5092 = vmatprep.subr.bf16.mxu0 %v6767_v21 }
 0x3c6   : > { %5138 = vmatpush1.bf16.msra.mxu1 %v5137_v37  ;;  %4168 = vmatprep.mubr.f32.mxu1 %v5788_v7 }
 0x3c7   : > { %5140 = vmatprep.subr.bf16.mxu1 %v6780_v36  ;;  %3480 = vmatmul.mubr.f32.gmra.mrb[20].mxu0 %v6704_v46 }
 0x3c8   : > { %3485 = vmatprep.mubr.f32.mxu0 %v5788_v7 }
 0x3c9   : > { %4170 = vmatmul.mubr.f32.gmra.mrb[20].mxu1 %v6704_v46 }
 0x3ca   : > { %4175 = vmatprep.mubr.f32.mxu1 %v5788_v7 }
 0x3cb   : > { %3487 = vmatmul.mubr.f32.gmra.mrb[22].mxu0 %v6706_v48 }
 0x3cc   : > { %3573 = vmatprep.mubr.f32.mxu0 %v5788_v7 }
 0x3cd   : > { %4177 = vmatmul.mubr.f32.gmra.mrb[22].mxu1 %v6706_v48 }
 0x3ce   : > { %4263 = vmatprep.mubr.f32.mxu1 %v5788_v7 }
 0x3cf   : > { %3576 = vmatmul.mubr.f32.vlgmr.msra.gmra.mrb[16].mxu0 %v6709_v10 }
 0x3d0   : > { %5094 = vmatpush1.bf16.msra.mxu0 %v6758_v23  ;;  %3581 = vmatprep.mubr.f32.mxu0 %v5788_v7 }
 0x3d1   : > { %4266 = vmatmul.mubr.f32.vlgmr.msra.gmra.mrb[16].mxu1 %v6709_v10  ;;  %5096 = vmatprep.subr.bf16.mxu0 %v6812_v31  ;;  %v7134_v10 = vld [vmem:[#allocation13_spill] sm:$0xff] }
 0x3d2   : > { %5142 = vmatpush1.bf16.msra.mxu1 %v6774_v63  ;;  %4271 = vmatprep.mubr.f32.mxu1 %v5788_v7 }
 0x3d3   : > { %5144 = vmatprep.subr.bf16.mxu1 %v6824_v40  ;;  %3584 = vmatmul.mubr.f32.gmra.mrb[18].mxu0 %v6712_v4 }
 0x3d4   : > { %5098 = vmatpush1.bf16.msra.mxu0 %v6808_v32  ;;  %3589 = vmatprep.mubr.f32.mxu0 %v5788_v7 }
 0x3d5   : > { %4274 = vmatmul.mubr.f32.gmra.mrb[18].mxu1 %v6712_v4  ;;  %5100 = vmatprep.subr.bf16.mxu0 %v5099_v0 }
 0x3d6   : > { %5146 = vmatpush1.bf16.msra.mxu1 %v6816_v20  ;;  %4279 = vmatprep.mubr.f32.mxu1 %v5788_v7 }
 0x3d7   : > { %5148 = vmatprep.subr.bf16.mxu1 %v5147_v18  ;;  %3592 = vmatmul.mubr.f32.gmra.mrb[20].mxu0 %v6715_v53 }
 0x3d8   : > { %3597 = vmatprep.mubr.f32.mxu0 %v5788_v7 }
 0x3d9   : > { %4282 = vmatmul.mubr.f32.gmra.mrb[20].mxu1 %v6715_v53 }
 0x3da   : > { %4287 = vmatprep.mubr.f32.mxu1 %v5788_v7 }
 0x3db   : > { %3600 = vmatmul.mubr.f32.gmra.mrb[22].mxu0 %v6718_v43 }
 0x3dc   : > { %3678 = vmatprep.mubr.f32.mxu0 %v5788_v7 }
 0x3dd   : > { %4290 = vmatmul.mubr.f32.gmra.mrb[22].mxu1 %v6718_v43 }
 0x3de   : > { %4368 = vmatprep.mubr.f32.mxu1 %v5788_v7 }
 0x3df   : > { %3682 = vmatmul.mubr.f32.vlgmr.msra.gmra.mrb[16].mxu0 %v6721_v42 }
 0x3e0   : > { %5102 = vmatpush1.bf16.msra.mxu0 %v6890_v52  ;;  %3687 = vmatprep.mubr.f32.mxu0 %v5788_v7 }
 0x3e1   : > { %4372 = vmatmul.mubr.f32.vlgmr.msra.gmra.mrb[16].mxu1 %v6721_v42  ;;  %5104 = vmatprep.subr.bf16.mxu0 %v6896_v29 }
 0x3e2   : > { %5150 = vmatpush1.bf16.msra.mxu1 %v6894_v9  ;;  %4377 = vmatprep.mubr.f32.mxu1 %v5788_v7 }
 0x3e3   : > { %5152 = vmatprep.subr.bf16.mxu1 %v6899_v6  ;;  %3691 = vmatmul.mubr.f32.gmra.mrb[18].mxu0 %v6724_v57 }
 0x3e4   : > { %5106 = vmatpush1.bf16.msra.mxu0 %v6901_v61  ;;  %3696 = vmatprep.mubr.f32.mxu0 %v5788_v7 }
 0x3e5   : > { %4381 = vmatmul.mubr.f32.gmra.mrb[18].mxu1 %v6724_v57  ;;  %5108 = vmatprep.subr.bf16.mxu0 %v6767_v21 }
 0x3e6   : > { %5154 = vmatpush1.bf16.msra.mxu1 %v6904_v12  ;;  %4386 = vmatprep.mubr.f32.mxu1 %v5788_v7 }
 0x3e7   : > { %5156 = vmatprep.subr.bf16.mxu1 %v6780_v36  ;;  %3700 = vmatmul.mubr.f32.gmra.mrb[20].mxu0 %v6727_v22 }
 0x3e8   : > { %3705 = vmatprep.mubr.f32.mxu0 %v5788_v7 }
 0x3e9   : > { %4390 = vmatmul.mubr.f32.gmra.mrb[20].mxu1 %v6727_v22 }
 0x3ea   : > { %4395 = vmatprep.mubr.f32.mxu1 %v5788_v7 }
 0x3eb   : > { %3709 = vmatmul.mubr.f32.gmra.mrb[22].mxu0 %v7134_v10 }
 0x3ec   : > { %3803 = vmatprep.mubr.f32.mxu0 %v5788_v7 }
 0x3ed   : > { %4399 = vmatmul.mubr.f32.gmra.mrb[22].mxu1 %v7134_v10 }
 0x3ee   : > { %4493 = vmatprep.mubr.f32.mxu1 %v5788_v7 }
 0x3ef   : > { %3805 = vmatmul.mubr.f32.vlgmr.msra.gmra.mrb[16].mxu0 %v6699_v59 }
 0x3f0   : > { %5110 = vmatpush1.bf16.msra.mxu0 %v6758_v23  ;;  %3810 = vmatprep.mubr.f32.mxu0 %v5788_v7 }
 0x3f1   : > { %4495 = vmatmul.mubr.f32.vlgmr.msra.gmra.mrb[16].mxu1 %v6699_v59  ;;  %5112 = vmatprep.subr.bf16.mxu0 %v6812_v31 }
 0x3f2   : > { %5158 = vmatpush1.bf16.msra.mxu1 %v6774_v63  ;;  %4500 = vmatprep.mubr.f32.mxu1 %v5788_v7  ;;  %v4641_v63 = vpop.permute.xlu0 %4640 }
 0x3f3   : > { %5160 = vmatprep.subr.bf16.mxu1 %v6824_v40  ;;  %3812 = vmatmul.mubr.f32.gmra.mrb[18].mxu0 %v6702_v1 }
 0x3f4   : > { %5114 = vmatpush1.bf16.msra.mxu0 %v6808_v32  ;;  %3817 = vmatprep.mubr.f32.mxu0 %v5788_v7 }
 0x3f5   : > { %4502 = vmatmul.mubr.f32.gmra.mrb[18].mxu1 %v6702_v1 }
 0x3f6   : > { %5162 = vmatpush1.bf16.msra.mxu1 %v6816_v20  ;;  %4507 = vmatprep.mubr.f32.mxu1 %v5788_v7  ;;  %v4653_v62 = vpop.permute.xlu0 %4652 }
 0x3f7   : > { %3819 = vmatmul.mubr.f32.gmra.mrb[20].mxu0 %v6704_v46 }
 0x3f8   : > { %3824 = vmatprep.mubr.f32.mxu0 %v5788_v7 }
 0x3f9   : > { %4509 = vmatmul.mubr.f32.gmra.mrb[20].mxu1 %v6704_v46 }
 0x3fa   : > { %4514 = vmatprep.mubr.f32.mxu1 %v5788_v7 }
 0x3fb   : > { %3826 = vmatmul.mubr.f32.gmra.mrb[22].mxu0 %v6706_v48 }
 0x3fc   : > { %3904 = vmatprep.mubr.f32.mxu0 %v5788_v7 }
 0x3fd   : > { %4516 = vmatmul.mubr.f32.gmra.mrb[22].mxu1 %v6706_v48 }
 0x3fe   : > { %4594 = vmatprep.mubr.f32.mxu1 %v5788_v7 }
 0x3ff   : > { %3906 = vmatmul.mubr.f32.vlgmr.msra.gmra.mrb[16].mxu0 %v6699_v59 }
 0x400   : > { %3911 = vmatprep.mubr.f32.mxu0 %v5788_v7 }
 0x401   : > { %4596 = vmatmul.mubr.f32.vlgmr.msra.gmra.mrb[16].mxu1 %v6699_v59 }
 0x402   : > { %4601 = vmatprep.mubr.f32.mxu1 %v5788_v7 }
 0x403   : > { %3913 = vmatmul.mubr.f32.gmra.mrb[18].mxu0 %v6702_v1 }
 0x404   : > { %3918 = vmatprep.mubr.f32.mxu0 %v5788_v7 }
 0x405   : > { %4603 = vmatmul.mubr.f32.gmra.mrb[18].mxu1 %v6702_v1 }
 0x406   : > { %4608 = vmatprep.mubr.f32.mxu1 %v5788_v7 }
 0x407   : > { %3920 = vmatmul.mubr.f32.gmra.mrb[20].mxu0 %v6704_v46 }
 0x408   : > { %3925 = vmatprep.mubr.f32.mxu0 %v5788_v7 }
 0x409   : > { %4610 = vmatmul.mubr.f32.gmra.mrb[20].mxu1 %v6704_v46 }
 0x40a   : > { %4615 = vmatprep.mubr.f32.mxu1 %v5788_v7 }
 0x40b   : > { %3927 = vmatmul.mubr.f32.gmra.mrb[22].mxu0 %v6706_v48 }
 0x40d   : > { %4617 = vmatmul.mubr.f32.gmra.mrb[22].mxu1 %v6706_v48 }
 0x4d2   : > { %v3907_v59 = vpop.f32.mrb[16].mxu0 }
 0x4d3   : > { %5586 = vtanh.f32 %v3907_v59  ;;  %v3909_v4 = vpop.f32.mrb[17].mxu0 }
 0x4d4   : > { %v4597_v53 = vpop.f32.mrb[16].mxu1  ;;  %5588 = vtanh.f32 %v3909_v4 }
 0x4d5   : > { %5590 = vtanh.f32 %v4597_v53  ;;  %v4599_v1 = vpop.f32.mrb[17].mxu1 }
 0x4d6   : > { %5592 = vtanh.f32 %v4599_v1  ;;  %v3914_v43 = vpop.f32.mrb[18].mxu0 }
 0x4d7   : > { %5594 = vtanh.f32 %v3914_v43  ;;  %v3916_v42 = vpop.f32.mrb[19].mxu0 }
 0x4d8   : > { %v4604_v57 = vpop.f32.mrb[18].mxu1  ;;  %5596 = vtanh.f32 %v3916_v42 }
 0x4d9   : > { %5598 = vtanh.f32 %v4604_v57  ;;  %v4606_v46 = vpop.f32.mrb[19].mxu1 }
 0x4da   : > { %5600 = vtanh.f32 %v4606_v46  ;;  %v3921_v7 = vpop.f32.mrb[20].mxu0 }
 0x4db   : > { %5602 = vtanh.f32 %v3921_v7  ;;  %v3923_v22 = vpop.f32.mrb[21].mxu0 }
 0x4dc   : > { %v4611_v48 = vpop.f32.mrb[20].mxu1  ;;  %5604 = vtanh.f32 %v3923_v22  ;;  %v5791_v22 = vmov 1966171168  }
 0x4dd   : > { %v5587_v39 = vpop.eup %5586  ;;  %5606 = vtanh.f32 %v4611_v48  ;;  %v4613_v51 = vpop.f32.mrb[21].mxu1  ;;  %v4723_v48 = vunpack.c.l.s4 %v5791_v22 }
 0x4de   : > { %v5589_v23 = vpop.eup %5588  ;;  %5608 = vtanh.f32 %v4613_v51  ;;  %v3928_v27 = vpop.f32.mrb[22].mxu0  ;;  %v4655_v47 = vmul.f32 %v5587_v39, %v4641_v63 }
 0x4df   : > { %v5591_v21 = vpop.eup %5590  ;;  %5610 = vtanh.f32 %v3928_v27  ;;  %v3930_v36 = vpop.f32.mrb[23].mxu0  ;;  %v4656_v49 = vmul.f32 %v5589_v23, %v4641_v63 }
 0x4e0   : > { %v5593_v25 = vpop.eup %5592  ;;  %v4618_v32 = vpop.f32.mrb[22].mxu1  ;;  %5612 = vtanh.f32 %v3930_v36  ;;  %v4657_v3 = vmul.f32 %v5591_v21, %v4641_v63  ;;  %v4724_v36 = vunpack.c.0.s8 %v4723_v48 }
 0x4e1   : > { %v5595_v31 = vpop.eup %5594  ;;  %5614 = vtanh.f32 %v4618_v32  ;;  %v4620_v20 = vpop.f32.mrb[23].mxu1  ;;  %v4658_v30 = vmul.f32 %v5593_v25, %v4641_v63 }
 0x4e2   : > { %v5597_v40 = vpop.eup %5596  ;;  %5616 = vtanh.f32 %v4620_v20  ;;  %v4659_v28 = vmul.f32 %v5595_v31, %v4645_v13  ;;  %v4710_v25 = vpop.permute.xlu1 %4709 }
 0x4e3   : > { %v5599_v54 = vpop.eup %5598  ;;  %v4660_v17 = vmul.f32 %v5597_v40, %v4645_v13 }
 0x4e4   : > { %v5601_v58 = vpop.eup %5600  ;;  %v4661_v34 = vmul.f32 %v5599_v54, %v4645_v13  ;;  %v4671_v14 = vadd.f32 %v4659_v28, %v4655_v47 }
 0x4e5   : > { %v5603_v38 = vpop.eup %5602  ;;  %v4662_v15 = vmul.f32 %v5601_v58, %v4645_v13  ;;  %v4680_v41 = vadd.f32 %v4660_v17, %v4656_v49  ;;  %v7135_v17 = vld [vmem:[#allocation12_spill] sm:$0xff] }
 0x4e6   : > { %v5605_v19 = vpop.eup %5604  ;;  %v4689_v16 = vadd.f32 %v4661_v34, %v4657_v3  ;;  %v4663_v8 = vmul.f32 %v5603_v38, %v4649_v5 }
 0x4e7   : > { %v5607_v11 = vpop.eup %5606  ;;  %v4698_v2 = vadd.f32 %v4662_v15, %v4658_v30  ;;  %v4664_v26 = vmul.f32 %v5605_v19, %v4649_v5 }
 0x4e8   : > { %v5609_v60 = vpop.eup %5608  ;;  %v4665_v45 = vmul.f32 %v5607_v11, %v4649_v5  ;;  %v4672_v37 = vadd.f32 %v4671_v14, %v4663_v8 }
 0x4e9   : > { %v5611_v44 = vpop.eup %5610  ;;  %v4666_v50 = vmul.f32 %v5609_v60, %v4649_v5  ;;  %v4681_v0 = vadd.f32 %v4680_v41, %v4664_v26  ;;  %v4727_v5 = vsub.s32 %v4724_v36, %v7135_v17 }
 0x4ea   : > { %v5613_v56 = vpop.eup %5612  ;;  %v4690_v18 = vadd.f32 %v4689_v16, %v4665_v45  ;;  %v4667_v55 = vmul.f32 %v5611_v44, %v4653_v62  ;;  %v7136_v16 = vlaneseq }
 0x4eb   : > { %v5615_v24 = vpop.eup %5614  ;;  %v4699_v52 = vadd.f32 %v4698_v2, %v4666_v50  ;;  %v4668_v35 = vmul.f32 %v5613_v56, %v4653_v62 }
 0x4ec   : > { %v5617_v9 = vpop.eup %5616  ;;  %v4669_v29 = vmul.f32 %v5615_v24, %v4653_v62  ;;  %v4673_v33 = vadd.f32 %v4672_v37, %v4667_v55  ;;  %vm4747_vm1 = vcmp.lt.s32.totalorder %v7136_v16, 512 }
 0x4ed   : > { %v4670_v6 = vmul.f32 %v5617_v9, %v4653_v62  ;;  %v4682_v61 = vadd.f32 %v4681_v0, %v4668_v35 }
 0x4ee   : > { %v4674_v12 = vrot.slane %v4673_v33, 4  ;;  %v4691_v10 = vadd.f32 %v4690_v18, %v4669_v29 }
 0x4ef   : > { %v4683_v59 = vrot.slane %v4682_v61, 4  ;;  %v4700_v4 = vadd.f32 %v4699_v52, %v4670_v6 }
 0x4f0   : > { %v4675_v53 = vadd.f32 %v4674_v12, %v4673_v33  ;;  %v4692_v1 = vrot.slane %v4691_v10, 4 }
 0x4f1   : > { %v4684_v43 = vadd.f32 %v4683_v59, %v4682_v61  ;;  %v4701_v42 = vrot.slane %v4700_v4, 4 }
 0x4f2   : > { %v4693_v57 = vadd.f32 %v4692_v1, %v4691_v10  ;;  %v4676_v46 = vrot.slane %v4675_v53, 2 }
 0x4f3   : > { %v4702_v7 = vadd.f32 %v4701_v42, %v4700_v4  ;;  %v4685_v39 = vrot.slane %v4684_v43, 2 }
 0x4f4   : > { %v4677_v51 = vadd.f32 %v4676_v46, %v4675_v53  ;;  %v4694_v13 = vrot.slane %v4693_v57, 2 }
 0x4f5   : > { %v4686_v23 = vadd.f32 %v4685_v39, %v4684_v43  ;;  %v4703_v27 = vrot.slane %v4702_v7, 2 }
 0x4f6   : > { %v4678_v21 = vrot.slane %v4677_v51, 1  ;;  %v4695_v63 = vadd.f32 %v4694_v13, %v4693_v57 }
 0x4f7   : > { %v4687_v32 = vrot.slane %v4686_v23, 1  ;;  %v4704_v31 = vadd.f32 %v4703_v27, %v4702_v7 }
 0x4f8   : > { %v4679_v20 = vadd.f32 %v4678_v21, %v4677_v51  ;;  %v4696_v40 = vrot.slane %v4695_v63, 1 }
 0x4f9   : > { %v4688_v47 = vadd.f32 %v4687_v32, %v4686_v23  ;;  %v4705_v28 = vrot.slane %v4704_v31, 1 }
 0x4fa   : > { %v4697_v54 = vadd.f32 %v4696_v40, %v4695_v63  ;;  %v4712_v49 = vadd.f32 %v4710_v25, %v4679_v20 }
 0x4fb   : > { %v4706_v58 = vadd.f32 %v4705_v28, %v4704_v31  ;;  %v4713_v3 = vadd.f32 %v4710_v25, %v4688_v47 }
 0x4fc   : > { %v4714_v34 = vadd.f32 %v4710_v25, %v4697_v54 }
 0x4fd   : > { %v4715_v14 = vadd.f32 %v4710_v25, %v4706_v58  ;;  %v4720_v38 = vcombine.low %v4712_v49, %v4713_v3 }
 0x4ff   : > { %v4721_v30 = vcombine.low %v4714_v34, %v4715_v14  ;;  %v4728_v15 = vrot.slane %v4720_v38, %v4727_v5 }
 0x501   : > { %v4735_v41 = vrot.slane %v4721_v30, %v4727_v5 }
 0x503   : > { %v4736_v19 = vcombine.low %v4728_v15, %v4735_v41 }
 0x505   : > { %v4743_v8 = vrot.slane %v4736_v19, %v4727_v5 }
 0x507   : > { %4749 = vst.msk [vmem:[%s215_s17] sm:$0xf] %vm4747_vm1, %v4743_v8 }
 0x508   : > { %5721 = shalt.err (!%p5718_p2)
}
 0x509   : > { %s5722_s11 = scalar_lea.hbm %s7018_s29, 64  ;;  %s5726_s8 = scalar_lea.hbm %s7065_s3, 128 }
 0x50a   : > { %p5723_p13 = scmp.ne.s32.totalorder %s7018_s29, %s5722_s11  ;;  %p5727_p4 = scmp.lt.u32.totalorder %s7018_s29, %s7065_s3 }
 0x50b   : > { %p5728_p5 = scmp.lt.u32.totalorder %s5726_s8, %s5722_s11  ;;  %p5730_p11 = scmp.lt.u32.totalorder %s5722_s11, %s7018_s29 }
 0x50c   : > { %p5724_p6 = pnand %p5723_p13, %p7137_p0 }
 0x50d   : > { %p5729_p8 = por %p5728_p5, %p5727_p4 }
 0x50e   : > { %p5725_p10 = pneg %p5724_p6 }
 0x50f   : > { %p5731_p1 = por %p5730_p11, %p5729_p8 }
 0x511   : > { %p5732_p3 = pnand %p5731_p1, %p5725_p10 }
 0x513   : > { %5735 = shalt.err (!%p5732_p3)
}
 0x514   : > { %5413 = dma.vmem_to_hbm [thread:$0]  (%p7137_p0), %s7020_s24, 64, %s7018_s29, %s4751_s30  }
 0x515 PF: > { %s4777_s22 = sand.u32 1, %s5766_s12   ;;  %p7138_p7 = scmp.ne.s32.totalorder %s7098_s19, 0 }
 0x516   : > { %p7139_p9 = scmp.ge.s32.totalorder %s5778_s15, 2  ;;  %s4778_s18 = scalar_lea.sflag [#allocation4], %s4777_s22 }
 0x518   : > { %p5427_p12 = pnand %p7139_p9, %p7138_p7 }
 0x51a   : > { %5761 = dma.done.wait (!%p5427_p12), %s4778_s18, 64  }
 0x51b   : > { %5763 = vsyncadd (!%p5427_p12), %s4778_s18, 4294967232  ;;  %p17_p2 = scmp.ge.s32.totalorder %s5923_s4, 4   ;;  %s7140_s12 = smov %s5770_s13 }
 0x51c   : > { %s7141_s13 = smov %s5774_s14  ;;  %s7142_s14 = smov %s5939_s9 }
 0x51d   : > { %s7143_s15 = smov %s5923_s4  ;;  %19 = sbr.rel (!%p17_p2) target bundleno = 6 (0x6), region = 88 }
 0x524   :  { %4783 = vsyncpa [#allocation3], 1 }
 0x525   :  { %4785 = vsyncpa [#allocation3 + $0x1], 1 }
 0x526   :  { %4786 = vsyncpa [#allocation6], 1 }
 0x527   :  { %4787 = vsyncpa [#allocation4], 1 }
 0x528   :  { %4789 = vsyncpa [#allocation4 + $0x1], 1 }

</bundles_post_ra>
